<compile_context>
chip_gen: v6e
topology: v6e:2x2x1
jax: 0.10.0
libtpu: 0.0.40
codegen_flags: <defaults>
</compile_context>

<pallas_src>
import functools
import math

import jax
import jax.numpy as jnp
from jax import lax
from jax.experimental import pallas as pl
from jax.experimental.pallas import tpu as pltpu

F32 = jnp.float32


# ---------------------------------------------------------------------------
# Small prologue kernel: y = x @ Wt + b   (weights already transposed to (K,N))
# ---------------------------------------------------------------------------
def _linear_kernel(x_ref, wt_ref, b_ref, o_ref):
    o_ref[...] = (
        jnp.dot(x_ref[...], wt_ref[...], preferred_element_type=jnp.float32)
        + b_ref[...]
    )


def _vmem():
    return pl.BlockSpec(memory_space=pltpu.MemorySpace.VMEM)


def linear(x, w_t, b_row):
    """x:(M,K), w_t:(K,N), b_row:(1,N) -> (M,N)."""
    M = x.shape[0]
    N = w_t.shape[1]
    return pl.pallas_call(
        _linear_kernel,
        out_shape=jax.ShapeDtypeStruct((M, N), F32),
        in_specs=[_vmem(), _vmem(), _vmem()],
        out_specs=_vmem(),
    )(x, w_t, b_row)


# ---------------------------------------------------------------------------
# Fused per-time-step kernel (grid axis = time step, sequential / "arbitrary")
# ---------------------------------------------------------------------------
def _fused_step_kernel(lin1_ref, w2_ref, b2_ref, w3_ref, b3_ref,
                       wr_ref, br_ref, wrec_ref, brec_ref,
                       wq_ref, bq_ref, wkv_ref, bkv_ref, wo_ref, bo_ref,
                       spk_sum_ref, reg_out_ref,
                       mem1_ref, mem2_ref, mem3_ref, mem_r_ref, spk_r_ref,
                       mem_o_ref, attn_ref, spk_acc_ref,
                       tot_ref, prev_ref, regacc_ref,
                       *, beta, thr, beta_r, thr_r, inv_scale, lm, n_out,
                       inv_nsteps):
    t = pl.program_id(0)

    @pl.when(t == 0)
    def _init():
        for r in (mem1_ref, mem2_ref, mem3_ref, mem_r_ref, spk_r_ref,
                  mem_o_ref, spk_acc_ref, tot_ref, prev_ref, regacc_ref):
            r[...] = jnp.zeros_like(r)

    def leaky(mem, cur, b_, th_):
        # snnTorch Leaky, reset_mechanism="subtract": reset from previous mem.
        reset = jnp.where(mem > th_, th_, 0.0)
        new_mem = b_ * mem + cur - reset
        spk = jnp.where(new_mem > th_, 1.0, 0.0)
        return new_mem, spk

    lin1 = lin1_ref[...]                                    # (B, nh) time-invariant

    # layers[:2]  : Linear1 -> Leaky1   (first call this step)
    m1, spk1_a = leaky(mem1_ref[...], lin1, beta, thr)
    # layers[:7]  : Linear1 -> Leaky1   (second call, SAME hidden state) -> ...
    m1, spk1_b = leaky(m1, lin1, beta, thr)
    mem1_ref[...] = m1

    cur2 = (jnp.dot(spk1_b, w2_ref[...], preferred_element_type=jnp.float32)
            + b2_ref[...])
    m2, spk2 = leaky(mem2_ref[...], cur2, beta, thr)
    mem2_ref[...] = m2

    # Dropout(0.3) -> identity (inference)
    cur3 = (jnp.dot(spk2, w3_ref[...], preferred_element_type=jnp.float32)
            + b3_ref[...])
    m3, spk3 = leaky(mem3_ref[...], cur3, beta, thr)
    mem3_ref[...] = m3

    # fcR -> RLeaky (all-to-all recurrence, beta=0.95, threshold=1.0 defaults),
    # driven by the FIRST Leaky1 spikes and the previous recurrent spikes.
    rlin = (jnp.dot(spk1_a, wr_ref[...], preferred_element_type=jnp.float32)
            + br_ref[...])
    rec = (jnp.dot(spk_r_ref[...], wrec_ref[...],
                   preferred_element_type=jnp.float32) + brec_ref[...])
    m_r = mem_r_ref[...]
    reset_r = jnp.where(m_r > thr_r, thr_r, 0.0)
    m_r = beta_r * m_r + rlin + rec - reset_r
    spk_r = jnp.where(m_r > thr_r, 1.0, 0.0)
    mem_r_ref[...] = m_r
    spk_r_ref[...] = spk_r

    # --- single-head spiking cross attention (seq len == 1) ---------------
    # q = Q(spk_r), k||v = KV(spk3) packed in one matmul. scores[i,j]=q_i k_j/sqrt(D)
    q_all = (jnp.dot(spk_r, wq_ref[...], preferred_element_type=jnp.float32)
             + bq_ref[...])                                 # (B, D)
    kv_all = (jnp.dot(spk3, wkv_ref[...], preferred_element_type=jnp.float32)
              + bkv_ref[...])                               # (B, 2D)
    B = q_all.shape[0]
    D = q_all.shape[1]
    k_all = kv_all[:, :D]
    v_all = kv_all[:, D:]
    eye = (lax.broadcasted_iota(jnp.int32, (D, D), 0)
           == lax.broadcasted_iota(jnp.int32, (D, D), 1)).astype(jnp.float32)

    for b in range(B):                                      # B is tiny -> unroll
        q_row = q_all[b:b + 1, :]                           # (1, D)
        k_row = k_all[b:b + 1, :]                           # (1, D)
        v_row = v_all[b:b + 1, :]                           # (1, D)
        # transpose-free row->column: k_col[j,0] = K[j]
        k_col = jnp.sum(k_row * eye, axis=1, keepdims=True)            # (D, 1)
        sT = (k_col * q_row) * inv_scale                    # sT[j,i]=K[j]Q[i]/scale
        m_row = jnp.max(sT, axis=0, keepdims=True)          # (1, D)
        pT = jnp.exp(sT - m_row)                            # (D, D)
        denom = jnp.sum(pT, axis=0, keepdims=True)          # (1, D)
        num = jnp.dot(v_row, pT, preferred_element_type=jnp.float32)   # (1, D)
        attn_ref[b:b + 1, :] = num * pl.reciprocal(denom, approx=True)

    # output projection (Wo zero-padded to lane-dense width)
    att = (jnp.dot(attn_ref[...], wo_ref[...],
                   preferred_element_type=jnp.float32) + bo_ref[...])   # (B, NOP)

    # output Leaky (same beta / threshold as the main network)
    m_o, spk_o = leaky(mem_o_ref[...], att, beta, thr)
    mem_o_ref[...] = m_o

    spk_acc_ref[...] = spk_acc_ref[...] + spk_o
    spk_sum_ref[...] = spk_acc_ref[...]

    # --- spike-rate / regularisation bookkeeping (all in VMEM) ------------
    def mean2d(v, inv_n):
        return jnp.sum(jnp.sum(v, axis=1, keepdims=True), axis=0,
                       keepdims=True) * inv_n

    nh = lin1_ref.shape[1]
    nr = mem_r_ref.shape[1]
    tot = (tot_ref[...]
           + mean2d(spk1_a, 1.0 / (B * nh))
           + mean2d(spk3, 1.0 / (B * nh))
           + mean2d(spk_r, 1.0 / (B * nr))
           + mean2d(spk_o, 1.0 / (B * n_out)))              # padded lanes are 0
    delta = jnp.where(t > 0, jnp.abs(tot - prev_ref[...]), jnp.zeros_like(tot))
    reg = regacc_ref[...] + lm * tot + lm * delta
    tot_ref[...] = tot
    prev_ref[...] = tot
    regacc_ref[...] = reg
    reg_out_ref[...] = reg * inv_nsteps                     # reg_loss / n_steps


def _fused_steps_call(lin1, params, cfg):
    B, nh = lin1.shape
    nr = cfg["n_hidden_RNN"]
    nout = cfg["n_output"]
    nsteps = cfg["n_steps"]
    D = nh
    NOP = params["wo_t"].shape[1]                           # padded output width

    kern = functools.partial(
        _fused_step_kernel,
        beta=cfg["beta"], thr=cfg["threshold"],
        beta_r=0.95, thr_r=1.0,                             # snn.RLeaky defaults
        inv_scale=1.0 / math.sqrt(D),                       # head_dim == d_model
        lm=cfg["lm_spN"], n_out=nout, inv_nsteps=1.0 / nsteps)

    inputs = (lin1,
              params["w2_t"], params["b2"],
              params["w3_t"], params["b3"],
              params["wr_t"], params["br"],
              params["wrec_t"], params["brec"],
              params["wq_t"], params["bq"],
              params["wkv_t"], params["bkv"],
              params["wo_t"], params["bo"])

    in_specs = [pl.BlockSpec(a.shape, lambda t: (0, 0)) for a in inputs]
    out_specs = (pl.BlockSpec((B, NOP), lambda t: (0, 0)),
                 pl.BlockSpec((1, 1), lambda t: (0, 0)))
    out_shape = (jax.ShapeDtypeStruct((B, NOP), F32),
                 jax.ShapeDtypeStruct((1, 1), F32))
    scratch = [
        pltpu.VMEM((B, nh), F32),    # mem1
        pltpu.VMEM((B, nh), F32),    # mem2
        pltpu.VMEM((B, nh), F32),    # mem3
        pltpu.VMEM((B, nr), F32),    # mem_r
        pltpu.VMEM((B, nr), F32),    # spk_r
        pltpu.VMEM((B, NOP), F32),   # mem_o
        pltpu.VMEM((B, D), F32),     # attention rows
        pltpu.VMEM((B, NOP), F32),   # spike-sum accumulator
        pltpu.VMEM((1, 1), F32),     # total_spikes
        pltpu.VMEM((1, 1), F32),     # total_spikes_prev
        pltpu.VMEM((1, 1), F32),     # reg_loss accumulator
    ]

    spk_sum_pad, reg = pl.pallas_call(
        kern,
        grid=(nsteps,),
        out_shape=out_shape,
        in_specs=in_specs,
        out_specs=out_specs,
        scratch_shapes=scratch,
        compiler_params=pltpu.CompilerParams(
            dimension_semantics=("arbitrary",)),
    )(*inputs)
    return spk_sum_pad, reg


# ---------------------------------------------------------------------------
# Parameters (PyTorch nn.Linear-like uniform init, stored pre-transposed/packed)
# ---------------------------------------------------------------------------
def _linear_init(key, out_f, in_f):
    kw, kb = jax.random.split(key)
    bound = 1.0 / math.sqrt(in_f)
    w = jax.random.uniform(kw, (out_f, in_f), F32, -bound, bound)
    b = jax.random.uniform(kb, (out_f,), F32, -bound, bound)
    return w, b


def init_params(key, cfg):
    nin, nh, nr, nout = (cfg["n_input"], cfg["n_hidden"],
                         cfg["n_hidden_RNN"], cfg["n_output"])
    D = nh
    patch_dim = cfg["in_channels"] * cfg["patch_size"] ** 2
    NOP = ((nout + 127) // 128) * 128

    keys = jax.random.split(key, 10)
    w_pe, b_pe = _linear_init(keys[0], cfg["embed_dim"], patch_dim)
    w1, b1 = _linear_init(keys[1], nh, nin)       # layers[0]
    w2, b2 = _linear_init(keys[2], nh, nh)        # layers[2]
    w3, b3 = _linear_init(keys[3], nh, nh)        # layers[5]
    wr, br = _linear_init(keys[4], nr, nh)        # fcR
    wrec, brec = _linear_init(keys[5], nr, nr)    # RLeaky recurrent V
    wq, bq = _linear_init(keys[6], D, nr)
    wk, bk = _linear_init(keys[7], D, D)
    wv, bv = _linear_init(keys[8], D, D)
    wo, bo = _linear_init(keys[9], nout, D)       # cross_last=True

    p = dict(
        w_pe_t=w_pe.T, b_pe=b_pe[None, :],
        pos_embed=jnp.zeros((1, cfg["num_patches"], cfg["embed_dim"]), F32),
        w1_t=w1.T, b1=b1[None, :],
        w2_t=w2.T, b2=b2[None, :],
        w3_t=w3.T, b3=b3[None, :],
        wr_t=wr.T, br=br[None, :],
        wrec_t=wrec.T, brec=brec[None, :],
        wq_t=wq.T, bq=bq[None, :],
        wkv_t=jnp.concatenate([wk.T, wv.T], axis=1),          # (D, 2D) packed
        bkv=jnp.concatenate([bk, bv])[None, :],               # (1, 2D)
        wo_t=jnp.zeros((D, NOP), F32).at[:, :nout].set(wo.T),  # lane-dense pad
        bo=jnp.zeros((1, NOP), F32).at[:, :nout].set(bo[None, :]),
    )
    return p


# ---------------------------------------------------------------------------
# Forward pass of ViT_RSNN_NoConv_MultiOutput
# ---------------------------------------------------------------------------
def vit_rsnn_forward(x, params, *, cfg):
    B, C, H, W = x.shape
    P, S = cfg["patch_size"], cfg["stride"]
    nph = (H - P) // S + 1
    npw = (W - P) // S + 1
    n_patches = nph * npw
    patch_dim = C * P * P
    ed = cfg["embed_dim"]

    # --- overlapping patch extraction as a single gather (torch .unfold) ---
    rows = (jnp.arange(nph) * S)[:, None] + jnp.arange(P)[None, :]   # (nph, P)
    cols = (jnp.arange(npw) * S)[:, None] + jnp.arange(P)[None, :]   # (npw, P)
    patches = x[:, :, rows[:, None, :, None], cols[None, :, None, :]]
    # (B, C, nph, npw, P, P) -> (B, n_patches, C*P*P), feature order (C, Ph, Pw)
    patches = patches.transpose(0, 2, 3, 1, 4, 5).reshape(B, n_patches, patch_dim)

    # patch embedding + positional embedding (Linear in Pallas, glue reshapes)
    emb = linear(patches.reshape(B * n_patches, patch_dim),
                 params["w_pe_t"], params["b_pe"])
    emb = emb.reshape(B, n_patches, ed) + params["pos_embed"]
    x_flat = emb.reshape(B, n_patches * ed)                          # (B, n_input)

    # Linear1(x_flat) is time-invariant -> hoisted out of the fused time loop.
    lin1 = linear(x_flat, params["w1_t"], params["b1"])              # (B, n_hidden)

    # --- the whole n_steps recurrent pipeline in one fused kernel ----------
    spk_sum_pad, reg = _fused_steps_call(lin1, params, cfg)

    nout = cfg["n_output"]
    nsteps = cfg["n_steps"]
    return spk_sum_pad[:, :nout] / nsteps, reg[0, 0]


# ---------------------------------------------------------------------------
if __name__ == "__main__":
    cfg = dict(
        image_size=16, patch_size=8, in_channels=1, embed_dim=16,
        n_hidden=128, n_hidden_RNN=32, n_output=11, n_steps=3,
        beta=0.8, threshold=0.5, lm_spN=0.001,
    )
    cfg["stride"] = int(cfg["patch_size"] * (1 - 0.5))               # 50% overlap
    nph = (cfg["image_size"] - cfg["patch_size"]) // cfg["stride"] + 1
    cfg["num_patches"] = nph * nph
    cfg["n_input"] = cfg["num_patches"] * cfg["embed_dim"]

    key = jax.random.PRNGKey(0)
    kp, kx = jax.random.split(key)
    params = init_params(kp, cfg)
    x = jax.random.normal(
        kx, (2, cfg["in_channels"], cfg["image_size"], cfg["image_size"]), F32)

    fwd = jax.jit(functools.partial(vit_rsnn_forward, cfg=cfg))
    spk_out, reg_loss = fwd(x, params)
    jax.block_until_ready((spk_out, reg_loss))

    assert spk_out.shape == (2, cfg["n_output"])
    assert reg_loss.shape == ()
    print("KERNEL_OK")
</pallas_src>

<mosaic_0001>
module attributes {stable_mosaic.version = 11 : i64} {
  func.func @_linear_kernel(%arg0: memref<2x144xf32, #tpu.memory_space<vmem>>, %arg1: memref<144x128xf32, #tpu.memory_space<vmem>>, %arg2: memref<1x128xf32, #tpu.memory_space<vmem>>, %arg3: memref<2x128xf32, #tpu.memory_space<vmem>>) attributes {dimension_semantics = [], scalar_prefetch = 0 : i64, scratch_operands = 0 : i64, tpu.core_type = #tpu.core_type<tc>} {
    %c0 = arith.constant 0 : index
    %c0_0 = arith.constant 0 : index
    %0 = vector.load %arg0[%c0, %c0_0] : memref<2x144xf32, #tpu.memory_space<vmem>>, vector<2x144xf32>
    %c0_1 = arith.constant 0 : index
    %c0_2 = arith.constant 0 : index
    %1 = vector.load %arg1[%c0_1, %c0_2] : memref<144x128xf32, #tpu.memory_space<vmem>>, vector<144x128xf32>
    %cst = arith.constant dense<0.000000e+00> : vector<2x128xf32>
    %2 = tpu.matmul %0, %1, %cst {dimension_numbers = #tpu.dot_dimension_numbers<[1], [0], [0], [1], [0, 0, 1, 1], [], []>} : vector<2x144xf32>, vector<144x128xf32>, vector<2x128xf32> -> vector<2x128xf32>
    %c0_3 = arith.constant 0 : index
    %c0_4 = arith.constant 0 : index
    %3 = vector.load %arg2[%c0_3, %c0_4] : memref<1x128xf32, #tpu.memory_space<vmem>>, vector<1x128xf32>
    %4 = vector.broadcast %3 : vector<1x128xf32> to vector<2x128xf32>
    %5 = arith.addf %2, %4 : vector<2x128xf32>
    %c0_5 = arith.constant 0 : index
    %c0_6 = arith.constant 0 : index
    %6 = vector.load %arg3[%c0_5, %c0_6] : memref<2x128xf32, #tpu.memory_space<vmem>>, vector<2x128xf32>
    tpu.vector_store %arg3[%c0_5, %c0_6], %5 {strides = array<i32>} : memref<2x128xf32, #tpu.memory_space<vmem>>, vector<2x128xf32>,
    return
  }
}

module attributes {stable_mosaic.version = 11 : i64} {
  func.func @_linear_kernel(%arg0: memref<18x64xf32, #tpu.memory_space<vmem>>, %arg1: memref<64x16xf32, #tpu.memory_space<vmem>>, %arg2: memref<1x16xf32, #tpu.memory_space<vmem>>, %arg3: memref<18x16xf32, #tpu.memory_space<vmem>>) attributes {dimension_semantics = [], scalar_prefetch = 0 : i64, scratch_operands = 0 : i64, tpu.core_type = #tpu.core_type<tc>} {
    %c0 = arith.constant 0 : index
    %c0_0 = arith.constant 0 : index
    %0 = vector.load %arg0[%c0, %c0_0] : memref<18x64xf32, #tpu.memory_space<vmem>>, vector<18x64xf32>
    %c0_1 = arith.constant 0 : index
    %c0_2 = arith.constant 0 : index
    %1 = vector.load %arg1[%c0_1, %c0_2] : memref<64x16xf32, #tpu.memory_space<vmem>>, vector<64x16xf32>
    %cst = arith.constant dense<0.000000e+00> : vector<18x16xf32>
    %2 = tpu.matmul %0, %1, %cst {dimension_numbers = #tpu.dot_dimension_numbers<[1], [0], [0], [1], [0, 0, 1, 1], [], []>} : vector<18x64xf32>, vector<64x16xf32>, vector<18x16xf32> -> vector<18x16xf32>
    %c0_3 = arith.constant 0 : index
    %c0_4 = arith.constant 0 : index
    %3 = vector.load %arg2[%c0_3, %c0_4] : memref<1x16xf32, #tpu.memory_space<vmem>>, vector<1x16xf32>
    %4 = vector.broadcast %3 : vector<1x16xf32> to vector<18x16xf32>
    %5 = arith.addf %2, %4 : vector<18x16xf32>
    %c0_5 = arith.constant 0 : index
    %c0_6 = arith.constant 0 : index
    %6 = vector.load %arg3[%c0_5, %c0_6] : memref<18x16xf32, #tpu.memory_space<vmem>>, vector<18x16xf32>
    tpu.vector_store %arg3[%c0_5, %c0_6], %5 {strides = array<i32>} : memref<18x16xf32, #tpu.memory_space<vmem>>, vector<18x16xf32>,
    return
  }
}

module attributes {stable_mosaic.version = 11 : i64} {
  func.func @_fused_step_kernel(%arg0: i32, %arg1: memref<2x128xf32, #tpu.memory_space<vmem>>, %arg2: memref<128x128xf32, #tpu.memory_space<vmem>>, %arg3: memref<1x128xf32, #tpu.memory_space<vmem>>, %arg4: memref<128x128xf32, #tpu.memory_space<vmem>>, %arg5: memref<1x128xf32, #tpu.memory_space<vmem>>, %arg6: memref<128x32xf32, #tpu.memory_space<vmem>>, %arg7: memref<1x32xf32, #tpu.memory_space<vmem>>, %arg8: memref<32x32xf32, #tpu.memory_space<vmem>>, %arg9: memref<1x32xf32, #tpu.memory_space<vmem>>, %arg10: memref<32x128xf32, #tpu.memory_space<vmem>>, %arg11: memref<1x128xf32, #tpu.memory_space<vmem>>, %arg12: memref<128x256xf32, #tpu.memory_space<vmem>>, %arg13: memref<1x256xf32, #tpu.memory_space<vmem>>, %arg14: memref<128x128xf32, #tpu.memory_space<vmem>>, %arg15: memref<1x128xf32, #tpu.memory_space<vmem>>, %arg16: memref<2x128xf32, #tpu.memory_space<vmem>>, %arg17: memref<1x1xf32, #tpu.memory_space<vmem>>, %arg18: memref<2x128xf32, #tpu.memory_space<vmem>>, %arg19: memref<2x128xf32, #tpu.memory_space<vmem>>, %arg20: memref<2x128xf32, #tpu.memory_space<vmem>>, %arg21: memref<2x32xf32, #tpu.memory_space<vmem>>, %arg22: memref<2x32xf32, #tpu.memory_space<vmem>>, %arg23: memref<2x128xf32, #tpu.memory_space<vmem>>, %arg24: memref<2x128xf32, #tpu.memory_space<vmem>>, %arg25: memref<2x128xf32, #tpu.memory_space<vmem>>, %arg26: memref<1x1xf32, #tpu.memory_space<vmem>>, %arg27: memref<1x1xf32, #tpu.memory_space<vmem>>, %arg28: memref<1x1xf32, #tpu.memory_space<vmem>>) attributes {dimension_semantics = [#tpu.dimension_semantics<arbitrary>], iteration_bounds = array<i64: 3>, scalar_prefetch = 0 : i64, scratch_operands = 11 : i64, tpu.core_type = #tpu.core_type<tc>, window_params = [{pipeline_mode = #tpu.pipeline_mode<synchronous>, transform_indices = @transform_0, window_bounds = array<i64: 2, 128>}, {pipeline_mode = #tpu.pipeline_mode<synchronous>, transform_indices = @transform_1, window_bounds = array<i64: 128, 128>}, {pipeline_mode = #tpu.pipeline_mode<synchronous>, transform_indices = @transform_2, window_bounds = array<i64: 1, 128>}, {pipeline_mode = #tpu.pipeline_mode<synchronous>, transform_indices = @transform_3, window_bounds = array<i64: 128, 128>}, {pipeline_mode = #tpu.pipeline_mode<synchronous>, transform_indices = @transform_4, window_bounds = array<i64: 1, 128>}, {pipeline_mode = #tpu.pipeline_mode<synchronous>, transform_indices = @transform_5, window_bounds = array<i64: 128, 32>}, {pipeline_mode = #tpu.pipeline_mode<synchronous>, transform_indices = @transform_6, window_bounds = array<i64: 1, 32>}, {pipeline_mode = #tpu.pipeline_mode<synchronous>, transform_indices = @transform_7, window_bounds = array<i64: 32, 32>}, {pipeline_mode = #tpu.pipeline_mode<synchronous>, transform_indices = @transform_8, window_bounds = array<i64: 1, 32>}, {pipeline_mode = #tpu.pipeline_mode<synchronous>, transform_indices = @transform_9, window_bounds = array<i64: 32, 128>}, {pipeline_mode = #tpu.pipeline_mode<synchronous>, transform_indices = @transform_10, window_bounds = array<i64: 1, 128>}, {pipeline_mode = #tpu.pipeline_mode<synchronous>, transform_indices = @transform_11, window_bounds = array<i64: 128, 256>}, {pipeline_mode = #tpu.pipeline_mode<synchronous>, transform_indices = @transform_12, window_bounds = array<i64: 1, 256>}, {pipeline_mode = #tpu.pipeline_mode<synchronous>, transform_indices = @transform_13, window_bounds = array<i64: 128, 128>}, {pipeline_mode = #tpu.pipeline_mode<synchronous>, transform_indices = @transform_14, window_bounds = array<i64: 1, 128>}, {pipeline_mode = #tpu.pipeline_mode<synchronous>, transform_indices = @transform_15, window_bounds = array<i64: 2, 128>}, {pipeline_mode = #tpu.pipeline_mode<synchronous>, transform_indices = @transform_16, window_bounds = array<i64: 1, 1>}]} {
    %c0_i32 = arith.constant 0 : i32
    %0 = arith.cmpi eq, %arg0, %c0_i32 : i32
    %1 = arith.extui %0 : i1 to i32
    %c0_i32_0 = arith.constant 0 : i32
    %2 = arith.cmpi ne, %1, %c0_i32_0 : i32
    scf.if %2 {
      %cst_156 = arith.constant 0.000000e+00 : f32
      %243 = vector.broadcast %cst_156 : f32 to vector<2x128xf32>
      %c0_157 = arith.constant 0 : index
      %c0_158 = arith.constant 0 : index
      %244 = vector.load %arg18[%c0_157, %c0_158] : memref<2x128xf32, #tpu.memory_space<vmem>>, vector<2x128xf32>
      tpu.vector_store %arg18[%c0_157, %c0_158], %243 {strides = array<i32>} : memref<2x128xf32, #tpu.memory_space<vmem>>, vector<2x128xf32>,
      %cst_159 = arith.constant 0.000000e+00 : f32
      %245 = vector.broadcast %cst_159 : f32 to vector<2x128xf32>
      %c0_160 = arith.constant 0 : index
      %c0_161 = arith.constant 0 : index
      %246 = vector.load %arg19[%c0_160, %c0_161] : memref<2x128xf32, #tpu.memory_space<vmem>>, vector<2x128xf32>
      tpu.vector_store %arg19[%c0_160, %c0_161], %245 {strides = array<i32>} : memref<2x128xf32, #tpu.memory_space<vmem>>, vector<2x128xf32>,
      %cst_162 = arith.constant 0.000000e+00 : f32
      %247 = vector.broadcast %cst_162 : f32 to vector<2x128xf32>
      %c0_163 = arith.constant 0 : index
      %c0_164 = arith.constant 0 : index
      %248 = vector.load %arg20[%c0_163, %c0_164] : memref<2x128xf32, #tpu.memory_space<vmem>>, vector<2x128xf32>
      tpu.vector_store %arg20[%c0_163, %c0_164], %247 {strides = array<i32>} : memref<2x128xf32, #tpu.memory_space<vmem>>, vector<2x128xf32>,
      %cst_165 = arith.constant 0.000000e+00 : f32
      %249 = vector.broadcast %cst_165 : f32 to vector<2x32xf32>
      %c0_166 = arith.constant 0 : index
      %c0_167 = arith.constant 0 : index
      %250 = vector.load %arg21[%c0_166, %c0_167] : memref<2x32xf32, #tpu.memory_space<vmem>>, vector<2x32xf32>
      tpu.vector_store %arg21[%c0_166, %c0_167], %249 {strides = array<i32>} : memref<2x32xf32, #tpu.memory_space<vmem>>, vector<2x32xf32>,
      %cst_168 = arith.constant 0.000000e+00 : f32
      %251 = vector.broadcast %cst_168 : f32 to vector<2x32xf32>
      %c0_169 = arith.constant 0 : index
      %c0_170 = arith.constant 0 : index
      %252 = vector.load %arg22[%c0_169, %c0_170] : memref<2x32xf32, #tpu.memory_space<vmem>>, vector<2x32xf32>
      tpu.vector_store %arg22[%c0_169, %c0_170], %251 {strides = array<i32>} : memref<2x32xf32, #tpu.memory_space<vmem>>, vector<2x32xf32>,
      %cst_171 = arith.constant 0.000000e+00 : f32
      %253 = vector.broadcast %cst_171 : f32 to vector<2x128xf32>
      %c0_172 = arith.constant 0 : index
      %c0_173 = arith.constant 0 : index
      %254 = vector.load %arg23[%c0_172, %c0_173] : memref<2x128xf32, #tpu.memory_space<vmem>>, vector<2x128xf32>
      tpu.vector_store %arg23[%c0_172, %c0_173], %253 {strides = array<i32>} : memref<2x128xf32, #tpu.memory_space<vmem>>, vector<2x128xf32>,
      %cst_174 = arith.constant 0.000000e+00 : f32
      %255 = vector.broadcast %cst_174 : f32 to vector<2x128xf32>
      %c0_175 = arith.constant 0 : index
      %c0_176 = arith.constant 0 : index
      %256 = vector.load %arg25[%c0_175, %c0_176] : memref<2x128xf32, #tpu.memory_space<vmem>>, vector<2x128xf32>
      tpu.vector_store %arg25[%c0_175, %c0_176], %255 {strides = array<i32>} : memref<2x128xf32, #tpu.memory_space<vmem>>, vector<2x128xf32>,
      %cst_177 = arith.constant 0.000000e+00 : f32
      %257 = vector.broadcast %cst_177 : f32 to vector<1x1xf32>
      %c0_178 = arith.constant 0 : index
      %c0_179 = arith.constant 0 : index
      %258 = vector.load %arg26[%c0_178, %c0_179] : memref<1x1xf32, #tpu.memory_space<vmem>>, vector<1x1xf32>
      tpu.vector_store %arg26[%c0_178, %c0_179], %257 {strides = array<i32>} : memref<1x1xf32, #tpu.memory_space<vmem>>, vector<1x1xf32>,
      %cst_180 = arith.constant 0.000000e+00 : f32
      %259 = vector.broadcast %cst_180 : f32 to vector<1x1xf32>
      %c0_181 = arith.constant 0 : index
      %c0_182 = arith.constant 0 : index
      %260 = vector.load %arg27[%c0_181, %c0_182] : memref<1x1xf32, #tpu.memory_space<vmem>>, vector<1x1xf32>
      tpu.vector_store %arg27[%c0_181, %c0_182], %259 {strides = array<i32>} : memref<1x1xf32, #tpu.memory_space<vmem>>, vector<1x1xf32>,
      %cst_183 = arith.constant 0.000000e+00 : f32
      %261 = vector.broadcast %cst_183 : f32 to vector<1x1xf32>
      %c0_184 = arith.constant 0 : index
      %c0_185 = arith.constant 0 : index
      %262 = vector.load %arg28[%c0_184, %c0_185] : memref<1x1xf32, #tpu.memory_space<vmem>>, vector<1x1xf32>
      tpu.vector_store %arg28[%c0_184, %c0_185], %261 {strides = array<i32>} : memref<1x1xf32, #tpu.memory_space<vmem>>, vector<1x1xf32>,
    } else {
    }
    %c0 = arith.constant 0 : index
    %c0_1 = arith.constant 0 : index
    %3 = vector.load %arg1[%c0, %c0_1] : memref<2x128xf32, #tpu.memory_space<vmem>>, vector<2x128xf32>
    %c0_2 = arith.constant 0 : index
    %c0_3 = arith.constant 0 : index
    %4 = vector.load %arg18[%c0_2, %c0_3] : memref<2x128xf32, #tpu.memory_space<vmem>>, vector<2x128xf32>
    %cst = arith.constant 5.000000e-01 : f32
    %5 = vector.broadcast %cst : f32 to vector<2x128xf32>
    %6 = arith.cmpf ogt, %4, %5 : vector<2x128xf32>
    %cst_4 = arith.constant 5.000000e-01 : f32
    %cst_5 = arith.constant 0.000000e+00 : f32
    %7 = vector.broadcast %cst_4 : f32 to vector<2x128xf32>
    %8 = vector.broadcast %cst_5 : f32 to vector<2x128xf32>
    %9 = arith.select %6, %7, %8 : vector<2x128xi1>, vector<2x128xf32>
    %cst_6 = arith.constant 8.000000e-01 : f32
    %10 = vector.broadcast %cst_6 : f32 to vector<2x128xf32>
    %11 = arith.mulf %10, %4 : vector<2x128xf32>
    %12 = arith.addf %11, %3 : vector<2x128xf32>
    %13 = arith.subf %12, %9 : vector<2x128xf32>
    %cst_7 = arith.constant 5.000000e-01 : f32
    %14 = vector.broadcast %cst_7 : f32 to vector<2x128xf32>
    %15 = arith.cmpf ogt, %13, %14 : vector<2x128xf32>
    %cst_8 = arith.constant 1.000000e+00 : f32
    %cst_9 = arith.constant 0.000000e+00 : f32
    %16 = vector.broadcast %cst_8 : f32 to vector<2x128xf32>
    %17 = vector.broadcast %cst_9 : f32 to vector<2x128xf32>
    %18 = arith.select %15, %16, %17 : vector<2x128xi1>, vector<2x128xf32>
    %cst_10 = arith.constant 5.000000e-01 : f32
    %19 = vector.broadcast %cst_10 : f32 to vector<2x128xf32>
    %20 = arith.cmpf ogt, %13, %19 : vector<2x128xf32>
    %cst_11 = arith.constant 5.000000e-01 : f32
    %cst_12 = arith.constant 0.000000e+00 : f32
    %21 = vector.broadcast %cst_11 : f32 to vector<2x128xf32>
    %22 = vector.broadcast %cst_12 : f32 to vector<2x128xf32>
    %23 = arith.select %20, %21, %22 : vector<2x128xi1>, vector<2x128xf32>
    %cst_13 = arith.constant 8.000000e-01 : f32
    %24 = vector.broadcast %cst_13 : f32 to vector<2x128xf32>
    %25 = arith.mulf %24, %13 : vector<2x128xf32>
    %26 = arith.addf %25, %3 : vector<2x128xf32>
    %27 = arith.subf %26, %23 : vector<2x128xf32>
    %cst_14 = arith.constant 5.000000e-01 : f32
    %28 = vector.broadcast %cst_14 : f32 to vector<2x128xf32>
    %29 = arith.cmpf ogt, %27, %28 : vector<2x128xf32>
    %cst_15 = arith.constant 1.000000e+00 : f32
    %cst_16 = arith.constant 0.000000e+00 : f32
    %30 = vector.broadcast %cst_15 : f32 to vector<2x128xf32>
    %31 = vector.broadcast %cst_16 : f32 to vector<2x128xf32>
    %32 = arith.select %29, %30, %31 : vector<2x128xi1>, vector<2x128xf32>
    %c0_17 = arith.constant 0 : index
    %c0_18 = arith.constant 0 : index
    %33 = vector.load %arg18[%c0_17, %c0_18] : memref<2x128xf32, #tpu.memory_space<vmem>>, vector<2x128xf32>
    tpu.vector_store %arg18[%c0_17, %c0_18], %27 {strides = array<i32>} : memref<2x128xf32, #tpu.memory_space<vmem>>, vector<2x128xf32>,
    %c0_19 = arith.constant 0 : index
    %c0_20 = arith.constant 0 : index
    %34 = vector.load %arg2[%c0_19, %c0_20] : memref<128x128xf32, #tpu.memory_space<vmem>>, vector<128x128xf32>
    %cst_21 = arith.constant dense<0.000000e+00> : vector<2x128xf32>
    %35 = tpu.matmul %32, %34, %cst_21 {dimension_numbers = #tpu.dot_dimension_numbers<[1], [0], [0], [1], [0, 0, 1, 1], [], []>} : vector<2x128xf32>, vector<128x128xf32>, vector<2x128xf32> -> vector<2x128xf32>
    %c0_22 = arith.constant 0 : index
    %c0_23 = arith.constant 0 : index
    %36 = vector.load %arg3[%c0_22, %c0_23] : memref<1x128xf32, #tpu.memory_space<vmem>>, vector<1x128xf32>
    %37 = vector.broadcast %36 : vector<1x128xf32> to vector<2x128xf32>
    %38 = arith.addf %35, %37 : vector<2x128xf32>
    %c0_24 = arith.constant 0 : index
    %c0_25 = arith.constant 0 : index
    %39 = vector.load %arg19[%c0_24, %c0_25] : memref<2x128xf32, #tpu.memory_space<vmem>>, vector<2x128xf32>
    %cst_26 = arith.constant 5.000000e-01 : f32
    %40 = vector.broadcast %cst_26 : f32 to vector<2x128xf32>
    %41 = arith.cmpf ogt, %39, %40 : vector<2x128xf32>
    %cst_27 = arith.constant 5.000000e-01 : f32
    %cst_28 = arith.constant 0.000000e+00 : f32
    %42 = vector.broadcast %cst_27 : f32 to vector<2x128xf32>
    %43 = vector.broadcast %cst_28 : f32 to vector<2x128xf32>
    %44 = arith.select %41, %42, %43 : vector<2x128xi1>, vector<2x128xf32>
    %cst_29 = arith.constant 8.000000e-01 : f32
    %45 = vector.broadcast %cst_29 : f32 to vector<2x128xf32>
    %46 = arith.mulf %45, %39 : vector<2x128xf32>
    %47 = arith.addf %46, %38 : vector<2x128xf32>
    %48 = arith.subf %47, %44 : vector<2x128xf32>
    %cst_30 = arith.constant 5.000000e-01 : f32
    %49 = vector.broadcast %cst_30 : f32 to vector<2x128xf32>
    %50 = arith.cmpf ogt, %48, %49 : vector<2x128xf32>
    %cst_31 = arith.constant 1.000000e+00 : f32
    %cst_32 = arith.constant 0.000000e+00 : f32
    %51 = vector.broadcast %cst_31 : f32 to vector<2x128xf32>
    %52 = vector.broadcast %cst_32 : f32 to vector<2x128xf32>
    %53 = arith.select %50, %51, %52 : vector<2x128xi1>, vector<2x128xf32>
    %c0_33 = arith.constant 0 : index
    %c0_34 = arith.constant 0 : index
    %54 = vector.load %arg19[%c0_33, %c0_34] : memref<2x128xf32, #tpu.memory_space<vmem>>, vector<2x128xf32>
    tpu.vector_store %arg19[%c0_33, %c0_34], %48 {strides = array<i32>} : memref<2x128xf32, #tpu.memory_space<vmem>>, vector<2x128xf32>,
    %c0_35 = arith.constant 0 : index
    %c0_36 = arith.constant 0 : index
    %55 = vector.load %arg4[%c0_35, %c0_36] : memref<128x128xf32, #tpu.memory_space<vmem>>, vector<128x128xf32>
    %cst_37 = arith.constant dense<0.000000e+00> : vector<2x128xf32>
    %56 = tpu.matmul %53, %55, %cst_37 {dimension_numbers = #tpu.dot_dimension_numbers<[1], [0], [0], [1], [0, 0, 1, 1], [], []>} : vector<2x128xf32>, vector<128x128xf32>, vector<2x128xf32> -> vector<2x128xf32>
    %c0_38 = arith.constant 0 : index
    %c0_39 = arith.constant 0 : index
    %57 = vector.load %arg5[%c0_38, %c0_39] : memref<1x128xf32, #tpu.memory_space<vmem>>, vector<1x128xf32>
    %58 = vector.broadcast %57 : vector<1x128xf32> to vector<2x128xf32>
    %59 = arith.addf %56, %58 : vector<2x128xf32>
    %c0_40 = arith.constant 0 : index
    %c0_41 = arith.constant 0 : index
    %60 = vector.load %arg20[%c0_40, %c0_41] : memref<2x128xf32, #tpu.memory_space<vmem>>, vector<2x128xf32>
    %cst_42 = arith.constant 5.000000e-01 : f32
    %61 = vector.broadcast %cst_42 : f32 to vector<2x128xf32>
    %62 = arith.cmpf ogt, %60, %61 : vector<2x128xf32>
    %cst_43 = arith.constant 5.000000e-01 : f32
    %cst_44 = arith.constant 0.000000e+00 : f32
    %63 = vector.broadcast %cst_43 : f32 to vector<2x128xf32>
    %64 = vector.broadcast %cst_44 : f32 to vector<2x128xf32>
    %65 = arith.select %62, %63, %64 : vector<2x128xi1>, vector<2x128xf32>
    %cst_45 = arith.constant 8.000000e-01 : f32
    %66 = vector.broadcast %cst_45 : f32 to vector<2x128xf32>
    %67 = arith.mulf %66, %60 : vector<2x128xf32>
    %68 = arith.addf %67, %59 : vector<2x128xf32>
    %69 = arith.subf %68, %65 : vector<2x128xf32>
    %cst_46 = arith.constant 5.000000e-01 : f32
    %70 = vector.broadcast %cst_46 : f32 to vector<2x128xf32>
    %71 = arith.cmpf ogt, %69, %70 : vector<2x128xf32>
    %cst_47 = arith.constant 1.000000e+00 : f32
    %cst_48 = arith.constant 0.000000e+00 : f32
    %72 = vector.broadcast %cst_47 : f32 to vector<2x128xf32>
    %73 = vector.broadcast %cst_48 : f32 to vector<2x128xf32>
    %74 = arith.select %71, %72, %73 : vector<2x128xi1>, vector<2x128xf32>
    %c0_49 = arith.constant 0 : index
    %c0_50 = arith.constant 0 : index
    %75 = vector.load %arg20[%c0_49, %c0_50] : memref<2x128xf32, #tpu.memory_space<vmem>>, vector<2x128xf32>
    tpu.vector_store %arg20[%c0_49, %c0_50], %69 {strides = array<i32>} : memref<2x128xf32, #tpu.memory_space<vmem>>, vector<2x128xf32>,
    %c0_51 = arith.constant 0 : index
    %c0_52 = arith.constant 0 : index
    %76 = vector.load %arg6[%c0_51, %c0_52] : memref<128x32xf32, #tpu.memory_space<vmem>>, vector<128x32xf32>
    %cst_53 = arith.constant dense<0.000000e+00> : vector<2x32xf32>
    %77 = tpu.matmul %18, %76, %cst_53 {dimension_numbers = #tpu.dot_dimension_numbers<[1], [0], [0], [1], [0, 0, 1, 1], [], []>} : vector<2x128xf32>, vector<128x32xf32>, vector<2x32xf32> -> vector<2x32xf32>
    %c0_54 = arith.constant 0 : index
    %c0_55 = arith.constant 0 : index
    %78 = vector.load %arg7[%c0_54, %c0_55] : memref<1x32xf32, #tpu.memory_space<vmem>>, vector<1x32xf32>
    %79 = vector.broadcast %78 : vector<1x32xf32> to vector<2x32xf32>
    %80 = arith.addf %77, %79 : vector<2x32xf32>
    %c0_56 = arith.constant 0 : index
    %c0_57 = arith.constant 0 : index
    %81 = vector.load %arg22[%c0_56, %c0_57] : memref<2x32xf32, #tpu.memory_space<vmem>>, vector<2x32xf32>
    %c0_58 = arith.constant 0 : index
    %c0_59 = arith.constant 0 : index
    %82 = vector.load %arg8[%c0_58, %c0_59] : memref<32x32xf32, #tpu.memory_space<vmem>>, vector<32x32xf32>
    %cst_60 = arith.constant dense<0.000000e+00> : vector<2x32xf32>
    %83 = tpu.matmul %81, %82, %cst_60 {dimension_numbers = #tpu.dot_dimension_numbers<[1], [0], [0], [1], [0, 0, 1, 1], [], []>} : vector<2x32xf32>, vector<32x32xf32>, vector<2x32xf32> -> vector<2x32xf32>
    %c0_61 = arith.constant 0 : index
    %c0_62 = arith.constant 0 : index
    %84 = vector.load %arg9[%c0_61, %c0_62] : memref<1x32xf32, #tpu.memory_space<vmem>>, vector<1x32xf32>
    %85 = vector.broadcast %84 : vector<1x32xf32> to vector<2x32xf32>
    %86 = arith.addf %83, %85 : vector<2x32xf32>
    %c0_63 = arith.constant 0 : index
    %c0_64 = arith.constant 0 : index
    %87 = vector.load %arg21[%c0_63, %c0_64] : memref<2x32xf32, #tpu.memory_space<vmem>>, vector<2x32xf32>
    %cst_65 = arith.constant 1.000000e+00 : f32
    %88 = vector.broadcast %cst_65 : f32 to vector<2x32xf32>
    %89 = arith.cmpf ogt, %87, %88 : vector<2x32xf32>
    %cst_66 = arith.constant 1.000000e+00 : f32
    %cst_67 = arith.constant 0.000000e+00 : f32
    %90 = vector.broadcast %cst_66 : f32 to vector<2x32xf32>
    %91 = vector.broadcast %cst_67 : f32 to vector<2x32xf32>
    %92 = arith.select %89, %90, %91 : vector<2x32xi1>, vector<2x32xf32>
    %cst_68 = arith.constant 0.949999988 : f32
    %93 = vector.broadcast %cst_68 : f32 to vector<2x32xf32>
    %94 = arith.mulf %93, %87 : vector<2x32xf32>
    %95 = arith.addf %94, %80 : vector<2x32xf32>
    %96 = arith.addf %95, %86 : vector<2x32xf32>
    %97 = arith.subf %96, %92 : vector<2x32xf32>
    %cst_69 = arith.constant 1.000000e+00 : f32
    %98 = vector.broadcast %cst_69 : f32 to vector<2x32xf32>
    %99 = arith.cmpf ogt, %97, %98 : vector<2x32xf32>
    %cst_70 = arith.constant 1.000000e+00 : f32
    %cst_71 = arith.constant 0.000000e+00 : f32
    %100 = vector.broadcast %cst_70 : f32 to vector<2x32xf32>
    %101 = vector.broadcast %cst_71 : f32 to vector<2x32xf32>
    %102 = arith.select %99, %100, %101 : vector<2x32xi1>, vector<2x32xf32>
    %c0_72 = arith.constant 0 : index
    %c0_73 = arith.constant 0 : index
    %103 = vector.load %arg21[%c0_72, %c0_73] : memref<2x32xf32, #tpu.memory_space<vmem>>, vector<2x32xf32>
    tpu.vector_store %arg21[%c0_72, %c0_73], %97 {strides = array<i32>} : memref<2x32xf32, #tpu.memory_space<vmem>>, vector<2x32xf32>,
    %c0_74 = arith.constant 0 : index
    %c0_75 = arith.constant 0 : index
    %104 = vector.load %arg22[%c0_74, %c0_75] : memref<2x32xf32, #tpu.memory_space<vmem>>, vector<2x32xf32>
    tpu.vector_store %arg22[%c0_74, %c0_75], %102 {strides = array<i32>} : memref<2x32xf32, #tpu.memory_space<vmem>>, vector<2x32xf32>,
    %c0_76 = arith.constant 0 : index
    %c0_77 = arith.constant 0 : index
    %105 = vector.load %arg10[%c0_76, %c0_77] : memref<32x128xf32, #tpu.memory_space<vmem>>, vector<32x128xf32>
    %cst_78 = arith.constant dense<0.000000e+00> : vector<2x128xf32>
    %106 = tpu.matmul %102, %105, %cst_78 {dimension_numbers = #tpu.dot_dimension_numbers<[1], [0], [0], [1], [0, 0, 1, 1], [], []>} : vector<2x32xf32>, vector<32x128xf32>, vector<2x128xf32> -> vector<2x128xf32>
    %c0_79 = arith.constant 0 : index
    %c0_80 = arith.constant 0 : index
    %107 = vector.load %arg11[%c0_79, %c0_80] : memref<1x128xf32, #tpu.memory_space<vmem>>, vector<1x128xf32>
    %108 = vector.broadcast %107 : vector<1x128xf32> to vector<2x128xf32>
    %109 = arith.addf %106, %108 : vector<2x128xf32>
    %c0_81 = arith.constant 0 : index
    %c0_82 = arith.constant 0 : index
    %110 = vector.load %arg12[%c0_81, %c0_82] : memref<128x256xf32, #tpu.memory_space<vmem>>, vector<128x256xf32>
    %cst_83 = arith.constant dense<0.000000e+00> : vector<2x256xf32>
    %111 = tpu.matmul %74, %110, %cst_83 {dimension_numbers = #tpu.dot_dimension_numbers<[1], [0], [0], [1], [0, 0, 1, 1], [], []>} : vector<2x128xf32>, vector<128x256xf32>, vector<2x256xf32> -> vector<2x256xf32>
    %c0_84 = arith.constant 0 : index
    %c0_85 = arith.constant 0 : index
    %112 = vector.load %arg13[%c0_84, %c0_85] : memref<1x256xf32, #tpu.memory_space<vmem>>, vector<1x256xf32>
    %113 = vector.broadcast %112 : vector<1x256xf32> to vector<2x256xf32>
    %114 = arith.addf %111, %113 : vector<2x256xf32>
    %115 = vector.extract_strided_slice %114 {offsets = [0, 0], sizes = [2, 128], strides = [1, 1]} : vector<2x256xf32> to vector<2x128xf32>
    %116 = vector.extract_strided_slice %114 {offsets = [0, 128], sizes = [2, 128], strides = [1, 1]} : vector<2x256xf32> to vector<2x128xf32>
    %117 = tpu.iota {dimensions = array<i32: 0>} : vector<128x128xi32>
    %118 = tpu.iota {dimensions = array<i32: 1>} : vector<128x128xi32>
    %119 = arith.cmpi eq, %117, %118 : vector<128x128xi32>
    %120 = arith.extui %119 : vector<128x128xi1> to vector<128x128xi32>
    %121 = arith.sitofp %120 : vector<128x128xi32> to vector<128x128xf32>
    %122 = vector.extract_strided_slice %109 {offsets = [0, 0], sizes = [1, 128], strides = [1, 1]} : vector<2x128xf32> to vector<1x128xf32>
    %123 = vector.extract_strided_slice %115 {offsets = [0, 0], sizes = [1, 128], strides = [1, 1]} : vector<2x128xf32> to vector<1x128xf32>
    %124 = vector.extract_strided_slice %116 {offsets = [0, 0], sizes = [1, 128], strides = [1, 1]} : vector<2x128xf32> to vector<1x128xf32>
    %125 = vector.broadcast %123 : vector<1x128xf32> to vector<128x128xf32>
    %126 = arith.mulf %125, %121 : vector<128x128xf32>
    %cst_86 = arith.constant dense<0.000000e+00> : vector<128xf32>
    %127 = vector.multi_reduction <add>, %126, %cst_86 [1] : vector<128x128xf32> to vector<128xf32>
    %128 = vector.shape_cast %127 : vector<128xf32> to vector<128x1xf32>
    %129 = vector.broadcast %128 : vector<128x1xf32> to vector<128x128xf32>
    %130 = vector.broadcast %122 : vector<1x128xf32> to vector<128x128xf32>
    %131 = arith.mulf %129, %130 : vector<128x128xf32>
    %cst_87 = arith.constant 0.0883883461 : f32
    %132 = vector.broadcast %cst_87 : f32 to vector<128x128xf32>
    %133 = arith.mulf %131, %132 : vector<128x128xf32>
    %cst_88 = arith.constant dense<0xFF800000> : vector<128xf32>
    %134 = vector.multi_reduction <maximumf>, %133, %cst_88 [0] : vector<128x128xf32> to vector<128xf32>
    %135 = vector.shape_cast %134 : vector<128xf32> to vector<1x128xf32>
    %136 = vector.broadcast %135 : vector<1x128xf32> to vector<128x128xf32>
    %137 = arith.subf %133, %136 : vector<128x128xf32>
    %138 = math.exp %137 : vector<128x128xf32>
    %cst_89 = arith.constant dense<0.000000e+00> : vector<128xf32>
    %139 = vector.multi_reduction <add>, %138, %cst_89 [0] : vector<128x128xf32> to vector<128xf32>
    %140 = vector.shape_cast %139 : vector<128xf32> to vector<1x128xf32>
    %cst_90 = arith.constant dense<0.000000e+00> : vector<1x128xf32>
    %141 = tpu.matmul %124, %138, %cst_90 {dimension_numbers = #tpu.dot_dimension_numbers<[1], [0], [0], [1], [0, 0, 1, 1], [], []>} : vector<1x128xf32>, vector<128x128xf32>, vector<1x128xf32> -> vector<1x128xf32>
    %142 = tpu.reciprocal %140 {approx = true} : vector<1x128xf32> -> vector<1x128xf32>
    %143 = arith.mulf %141, %142 : vector<1x128xf32>
    %c0_91 = arith.constant 0 : index
    %c0_92 = arith.constant 0 : index
    %144 = vector.load %arg24[%c0_91, %c0_92] : memref<2x128xf32, #tpu.memory_space<vmem>>, vector<1x128xf32>
    tpu.vector_store %arg24[%c0_91, %c0_92], %143 {strides = array<i32>} : memref<2x128xf32, #tpu.memory_space<vmem>>, vector<1x128xf32>,
    %145 = vector.extract_strided_slice %109 {offsets = [1, 0], sizes = [1, 128], strides = [1, 1]} : vector<2x128xf32> to vector<1x128xf32>
    %146 = vector.extract_strided_slice %115 {offsets = [1, 0], sizes = [1, 128], strides = [1, 1]} : vector<2x128xf32> to vector<1x128xf32>
    %147 = vector.extract_strided_slice %116 {offsets = [1, 0], sizes = [1, 128], strides = [1, 1]} : vector<2x128xf32> to vector<1x128xf32>
    %148 = vector.broadcast %146 : vector<1x128xf32> to vector<128x128xf32>
    %149 = arith.mulf %148, %121 : vector<128x128xf32>
    %cst_93 = arith.constant dense<0.000000e+00> : vector<128xf32>
    %150 = vector.multi_reduction <add>, %149, %cst_93 [1] : vector<128x128xf32> to vector<128xf32>
    %151 = vector.shape_cast %150 : vector<128xf32> to vector<128x1xf32>
    %152 = vector.broadcast %151 : vector<128x1xf32> to vector<128x128xf32>
    %153 = vector.broadcast %145 : vector<1x128xf32> to vector<128x128xf32>
    %154 = arith.mulf %152, %153 : vector<128x128xf32>
    %cst_94 = arith.constant 0.0883883461 : f32
    %155 = vector.broadcast %cst_94 : f32 to vector<128x128xf32>
    %156 = arith.mulf %154, %155 : vector<128x128xf32>
    %cst_95 = arith.constant dense<0xFF800000> : vector<128xf32>
    %157 = vector.multi_reduction <maximumf>, %156, %cst_95 [0] : vector<128x128xf32> to vector<128xf32>
    %158 = vector.shape_cast %157 : vector<128xf32> to vector<1x128xf32>
    %159 = vector.broadcast %158 : vector<1x128xf32> to vector<128x128xf32>
    %160 = arith.subf %156, %159 : vector<128x128xf32>
    %161 = math.exp %160 : vector<128x128xf32>
    %cst_96 = arith.constant dense<0.000000e+00> : vector<128xf32>
    %162 = vector.multi_reduction <add>, %161, %cst_96 [0] : vector<128x128xf32> to vector<128xf32>
    %163 = vector.shape_cast %162 : vector<128xf32> to vector<1x128xf32>
    %cst_97 = arith.constant dense<0.000000e+00> : vector<1x128xf32>
    %164 = tpu.matmul %147, %161, %cst_97 {dimension_numbers = #tpu.dot_dimension_numbers<[1], [0], [0], [1], [0, 0, 1, 1], [], []>} : vector<1x128xf32>, vector<128x128xf32>, vector<1x128xf32> -> vector<1x128xf32>
    %165 = tpu.reciprocal %163 {approx = true} : vector<1x128xf32> -> vector<1x128xf32>
    %166 = arith.mulf %164, %165 : vector<1x128xf32>
    %c1 = arith.constant 1 : index
    %c0_98 = arith.constant 0 : index
    %167 = vector.load %arg24[%c1, %c0_98] : memref<2x128xf32, #tpu.memory_space<vmem>>, vector<1x128xf32>
    tpu.vector_store %arg24[%c1, %c0_98], %166 {strides = array<i32>} : memref<2x128xf32, #tpu.memory_space<vmem>>, vector<1x128xf32>,
    %c0_99 = arith.constant 0 : index
    %c0_100 = arith.constant 0 : index
    %168 = vector.load %arg24[%c0_99, %c0_100] : memref<2x128xf32, #tpu.memory_space<vmem>>, vector<2x128xf32>
    %c0_101 = arith.constant 0 : index
    %c0_102 = arith.constant 0 : index
    %169 = vector.load %arg14[%c0_101, %c0_102] : memref<128x128xf32, #tpu.memory_space<vmem>>, vector<128x128xf32>
    %cst_103 = arith.constant dense<0.000000e+00> : vector<2x128xf32>
    %170 = tpu.matmul %168, %169, %cst_103 {dimension_numbers = #tpu.dot_dimension_numbers<[1], [0], [0], [1], [0, 0, 1, 1], [], []>} : vector<2x128xf32>, vector<128x128xf32>, vector<2x128xf32> -> vector<2x128xf32>
    %c0_104 = arith.constant 0 : index
    %c0_105 = arith.constant 0 : index
    %171 = vector.load %arg15[%c0_104, %c0_105] : memref<1x128xf32, #tpu.memory_space<vmem>>, vector<1x128xf32>
    %172 = vector.broadcast %171 : vector<1x128xf32> to vector<2x128xf32>
    %173 = arith.addf %170, %172 : vector<2x128xf32>
    %c0_106 = arith.constant 0 : index
    %c0_107 = arith.constant 0 : index
    %174 = vector.load %arg23[%c0_106, %c0_107] : memref<2x128xf32, #tpu.memory_space<vmem>>, vector<2x128xf32>
    %cst_108 = arith.constant 5.000000e-01 : f32
    %175 = vector.broadcast %cst_108 : f32 to vector<2x128xf32>
    %176 = arith.cmpf ogt, %174, %175 : vector<2x128xf32>
    %cst_109 = arith.constant 5.000000e-01 : f32
    %cst_110 = arith.constant 0.000000e+00 : f32
    %177 = vector.broadcast %cst_109 : f32 to vector<2x128xf32>
    %178 = vector.broadcast %cst_110 : f32 to vector<2x128xf32>
    %179 = arith.select %176, %177, %178 : vector<2x128xi1>, vector<2x128xf32>
    %cst_111 = arith.constant 8.000000e-01 : f32
    %180 = vector.broadcast %cst_111 : f32 to vector<2x128xf32>
    %181 = arith.mulf %180, %174 : vector<2x128xf32>
    %182 = arith.addf %181, %173 : vector<2x128xf32>
    %183 = arith.subf %182, %179 : vector<2x128xf32>
    %cst_112 = arith.constant 5.000000e-01 : f32
    %184 = vector.broadcast %cst_112 : f32 to vector<2x128xf32>
    %185 = arith.cmpf ogt, %183, %184 : vector<2x128xf32>
    %cst_113 = arith.constant 1.000000e+00 : f32
    %cst_114 = arith.constant 0.000000e+00 : f32
    %186 = vector.broadcast %cst_113 : f32 to vector<2x128xf32>
    %187 = vector.broadcast %cst_114 : f32 to vector<2x128xf32>
    %188 = arith.select %185, %186, %187 : vector<2x128xi1>, vector<2x128xf32>
    %c0_115 = arith.constant 0 : index
    %c0_116 = arith.constant 0 : index
    %189 = vector.load %arg23[%c0_115, %c0_116] : memref<2x128xf32, #tpu.memory_space<vmem>>, vector<2x128xf32>
    tpu.vector_store %arg23[%c0_115, %c0_116], %183 {strides = array<i32>} : memref<2x128xf32, #tpu.memory_space<vmem>>, vector<2x128xf32>,
    %c0_117 = arith.constant 0 : index
    %c0_118 = arith.constant 0 : index
    %190 = vector.load %arg25[%c0_117, %c0_118] : memref<2x128xf32, #tpu.memory_space<vmem>>, vector<2x128xf32>
    %191 = arith.addf %190, %188 : vector<2x128xf32>
    %c0_119 = arith.constant 0 : index
    %c0_120 = arith.constant 0 : index
    %192 = vector.load %arg25[%c0_119, %c0_120] : memref<2x128xf32, #tpu.memory_space<vmem>>, vector<2x128xf32>
    tpu.vector_store %arg25[%c0_119, %c0_120], %191 {strides = array<i32>} : memref<2x128xf32, #tpu.memory_space<vmem>>, vector<2x128xf32>,
    %c0_121 = arith.constant 0 : index
    %c0_122 = arith.constant 0 : index
    %193 = vector.load %arg25[%c0_121, %c0_122] : memref<2x128xf32, #tpu.memory_space<vmem>>, vector<2x128xf32>
    %c0_123 = arith.constant 0 : index
    %c0_124 = arith.constant 0 : index
    %194 = vector.load %arg16[%c0_123, %c0_124] : memref<2x128xf32, #tpu.memory_space<vmem>>, vector<2x128xf32>
    tpu.vector_store %arg16[%c0_123, %c0_124], %193 {strides = array<i32>} : memref<2x128xf32, #tpu.memory_space<vmem>>, vector<2x128xf32>,
    %c0_125 = arith.constant 0 : index
    %c0_126 = arith.constant 0 : index
    %195 = vector.load %arg26[%c0_125, %c0_126] : memref<1x1xf32, #tpu.memory_space<vmem>>, vector<1x1xf32>
    %cst_127 = arith.constant dense<0.000000e+00> : vector<2xf32>
    %196 = vector.multi_reduction <add>, %18, %cst_127 [1] : vector<2x128xf32> to vector<2xf32>
    %197 = vector.shape_cast %196 : vector<2xf32> to vector<2x1xf32>
    %cst_128 = arith.constant dense<0.000000e+00> : vector<1xf32>
    %198 = vector.multi_reduction <add>, %197, %cst_128 [0] : vector<2x1xf32> to vector<1xf32>
    %199 = vector.shape_cast %198 : vector<1xf32> to vector<1x1xf32>
    %cst_129 = arith.constant 3.906250e-03 : f32
    %200 = vector.broadcast %cst_129 : f32 to vector<1x1xf32>
    %201 = arith.mulf %199, %200 : vector<1x1xf32>
    %202 = arith.addf %195, %201 : vector<1x1xf32>
    %cst_130 = arith.constant dense<0.000000e+00> : vector<2xf32>
    %203 = vector.multi_reduction <add>, %74, %cst_130 [1] : vector<2x128xf32> to vector<2xf32>
    %204 = vector.shape_cast %203 : vector<2xf32> to vector<2x1xf32>
    %cst_131 = arith.constant dense<0.000000e+00> : vector<1xf32>
    %205 = vector.multi_reduction <add>, %204, %cst_131 [0] : vector<2x1xf32> to vector<1xf32>
    %206 = vector.shape_cast %205 : vector<1xf32> to vector<1x1xf32>
    %cst_132 = arith.constant 3.906250e-03 : f32
    %207 = vector.broadcast %cst_132 : f32 to vector<1x1xf32>
    %208 = arith.mulf %206, %207 : vector<1x1xf32>
    %209 = arith.addf %202, %208 : vector<1x1xf32>
    %cst_133 = arith.constant dense<0.000000e+00> : vector<2xf32>
    %210 = vector.multi_reduction <add>, %102, %cst_133 [1] : vector<2x32xf32> to vector<2xf32>
    %211 = vector.shape_cast %210 : vector<2xf32> to vector<2x1xf32>
    %cst_134 = arith.constant dense<0.000000e+00> : vector<1xf32>
    %212 = vector.multi_reduction <add>, %211, %cst_134 [0] : vector<2x1xf32> to vector<1xf32>
    %213 = vector.shape_cast %212 : vector<1xf32> to vector<1x1xf32>
    %cst_135 = arith.constant 1.562500e-02 : f32
    %214 = vector.broadcast %cst_135 : f32 to vector<1x1xf32>
    %215 = arith.mulf %213, %214 : vector<1x1xf32>
    %216 = arith.addf %209, %215 : vector<1x1xf32>
    %cst_136 = arith.constant dense<0.000000e+00> : vector<2xf32>
    %217 = vector.multi_reduction <add>, %188, %cst_136 [1] : vector<2x128xf32> to vector<2xf32>
    %218 = vector.shape_cast %217 : vector<2xf32> to vector<2x1xf32>
    %cst_137 = arith.constant dense<0.000000e+00> : vector<1xf32>
    %219 = vector.multi_reduction <add>, %218, %cst_137 [0] : vector<2x1xf32> to vector<1xf32>
    %220 = vector.shape_cast %219 : vector<1xf32> to vector<1x1xf32>
    %cst_138 = arith.constant 0.0454545468 : f32
    %221 = vector.broadcast %cst_138 : f32 to vector<1x1xf32>
    %222 = arith.mulf %220, %221 : vector<1x1xf32>
    %223 = arith.addf %216, %222 : vector<1x1xf32>
    %c0_i32_139 = arith.constant 0 : i32
    %224 = arith.cmpi sgt, %arg0, %c0_i32_139 : i32
    %c0_140 = arith.constant 0 : index
    %c0_141 = arith.constant 0 : index
    %225 = vector.load %arg27[%c0_140, %c0_141] : memref<1x1xf32, #tpu.memory_space<vmem>>, vector<1x1xf32>
    %226 = arith.subf %223, %225 : vector<1x1xf32>
    %227 = math.absf %226 : vector<1x1xf32>
    %cst_142 = arith.constant 0.000000e+00 : f32
    %228 = vector.broadcast %cst_142 : f32 to vector<1x1xf32>
    %229 = arith.select %224, %227, %228 : vector<1x1xf32>
    %c0_143 = arith.constant 0 : index
    %c0_144 = arith.constant 0 : index
    %230 = vector.load %arg28[%c0_143, %c0_144] : memref<1x1xf32, #tpu.memory_space<vmem>>, vector<1x1xf32>
    %cst_145 = arith.constant 1.000000e-03 : f32
    %231 = vector.broadcast %cst_145 : f32 to vector<1x1xf32>
    %232 = arith.mulf %231, %223 : vector<1x1xf32>
    %233 = arith.addf %230, %232 : vector<1x1xf32>
    %cst_146 = arith.constant 1.000000e-03 : f32
    %234 = vector.broadcast %cst_146 : f32 to vector<1x1xf32>
    %235 = arith.mulf %234, %229 : vector<1x1xf32>
    %236 = arith.addf %233, %235 : vector<1x1xf32>
    %c0_147 = arith.constant 0 : index
    %c0_148 = arith.constant 0 : index
    %237 = vector.load %arg26[%c0_147, %c0_148] : memref<1x1xf32, #tpu.memory_space<vmem>>, vector<1x1xf32>
    tpu.vector_store %arg26[%c0_147, %c0_148], %223 {strides = array<i32>} : memref<1x1xf32, #tpu.memory_space<vmem>>, vector<1x1xf32>,
    %c0_149 = arith.constant 0 : index
    %c0_150 = arith.constant 0 : index
    %238 = vector.load %arg27[%c0_149, %c0_150] : memref<1x1xf32, #tpu.memory_space<vmem>>, vector<1x1xf32>
    tpu.vector_store %arg27[%c0_149, %c0_150], %223 {strides = array<i32>} : memref<1x1xf32, #tpu.memory_space<vmem>>, vector<1x1xf32>,
    %c0_151 = arith.constant 0 : index
    %c0_152 = arith.constant 0 : index
    %239 = vector.load %arg28[%c0_151, %c0_152] : memref<1x1xf32, #tpu.memory_space<vmem>>, vector<1x1xf32>
    tpu.vector_store %arg28[%c0_151, %c0_152], %236 {strides = array<i32>} : memref<1x1xf32, #tpu.memory_space<vmem>>, vector<1x1xf32>,
    %cst_153 = arith.constant 0.333333343 : f32
    %240 = vector.broadcast %cst_153 : f32 to vector<1x1xf32>
    %241 = arith.mulf %236, %240 : vector<1x1xf32>
    %c0_154 = arith.constant 0 : index
    %c0_155 = arith.constant 0 : index
    %242 = vector.load %arg17[%c0_154, %c0_155] : memref<1x1xf32, #tpu.memory_space<vmem>>, vector<1x1xf32>
    tpu.vector_store %arg17[%c0_154, %c0_155], %241 {strides = array<i32>} : memref<1x1xf32, #tpu.memory_space<vmem>>, vector<1x1xf32>,
    return
  }
  func.func @transform_0(%arg0: i32) -> (i32, i32) {
    %c0_i32 = arith.constant 0 : i32
    %c0_i32_0 = arith.constant 0 : i32
    %c0_i32_1 = arith.constant 0 : i32
    return %c0_i32, %c0_i32_0 : i32, i32
  }
  func.func @transform_1(%arg0: i32) -> (i32, i32) {
    %c0_i32 = arith.constant 0 : i32
    %c0_i32_0 = arith.constant 0 : i32
    %c0_i32_1 = arith.constant 0 : i32
    return %c0_i32, %c0_i32_0 : i32, i32
  }
  func.func @transform_2(%arg0: i32) -> (i32, i32) {
    %c0_i32 = arith.constant 0 : i32
    %c0_i32_0 = arith.constant 0 : i32
    %c0_i32_1 = arith.constant 0 : i32
    return %c0_i32, %c0_i32_0 : i32, i32
  }
  func.func @transform_3(%arg0: i32) -> (i32, i32) {
    %c0_i32 = arith.constant 0 : i32
    %c0_i32_0 = arith.constant 0 : i32
    %c0_i32_1 = arith.constant 0 : i32
    return %c0_i32, %c0_i32_0 : i32, i32
  }
  func.func @transform_4(%arg0: i32) -> (i32, i32) {
    %c0_i32 = arith.constant 0 : i32
    %c0_i32_0 = arith.constant 0 : i32
    %c0_i32_1 = arith.constant 0 : i32
    return %c0_i32, %c0_i32_0 : i32, i32
  }
  func.func @transform_5(%arg0: i32) -> (i32, i32) {
    %c0_i32 = arith.constant 0 : i32
    %c0_i32_0 = arith.constant 0 : i32
    %c0_i32_1 = arith.constant 0 : i32
    return %c0_i32, %c0_i32_0 : i32, i32
  }
  func.func @transform_6(%arg0: i32) -> (i32, i32) {
    %c0_i32 = arith.constant 0 : i32
    %c0_i32_0 = arith.constant 0 : i32
    %c0_i32_1 = arith.constant 0 : i32
    return %c0_i32, %c0_i32_0 : i32, i32
  }
  func.func @transform_7(%arg0: i32) -> (i32, i32) {
    %c0_i32 = arith.constant 0 : i32
    %c0_i32_0 = arith.constant 0 : i32
    %c0_i32_1 = arith.constant 0 : i32
    return %c0_i32, %c0_i32_0 : i32, i32
  }
  func.func @transform_8(%arg0: i32) -> (i32, i32) {
    %c0_i32 = arith.constant 0 : i32
    %c0_i32_0 = arith.constant 0 : i32
    %c0_i32_1 = arith.constant 0 : i32
    return %c0_i32, %c0_i32_0 : i32, i32
  }
  func.func @transform_9(%arg0: i32) -> (i32, i32) {
    %c0_i32 = arith.constant 0 : i32
    %c0_i32_0 = arith.constant 0 : i32
    %c0_i32_1 = arith.constant 0 : i32
    return %c0_i32, %c0_i32_0 : i32, i32
  }
  func.func @transform_10(%arg0: i32) -> (i32, i32) {
    %c0_i32 = arith.constant 0 : i32
    %c0_i32_0 = arith.constant 0 : i32
    %c0_i32_1 = arith.constant 0 : i32
    return %c0_i32, %c0_i32_0 : i32, i32
  }
  func.func @transform_11(%arg0: i32) -> (i32, i32) {
    %c0_i32 = arith.constant 0 : i32
    %c0_i32_0 = arith.constant 0 : i32
    %c0_i32_1 = arith.constant 0 : i32
    return %c0_i32, %c0_i32_0 : i32, i32
  }
  func.func @transform_12(%arg0: i32) -> (i32, i32) {
    %c0_i32 = arith.constant 0 : i32
    %c0_i32_0 = arith.constant 0 : i32
    %c0_i32_1 = arith.constant 0 : i32
    return %c0_i32, %c0_i32_0 : i32, i32
  }
  func.func @transform_13(%arg0: i32) -> (i32, i32) {
    %c0_i32 = arith.constant 0 : i32
    %c0_i32_0 = arith.constant 0 : i32
    %c0_i32_1 = arith.constant 0 : i32
    return %c0_i32, %c0_i32_0 : i32, i32
  }
  func.func @transform_14(%arg0: i32) -> (i32, i32) {
    %c0_i32 = arith.constant 0 : i32
    %c0_i32_0 = arith.constant 0 : i32
    %c0_i32_1 = arith.constant 0 : i32
    return %c0_i32, %c0_i32_0 : i32, i32
  }
  func.func @transform_15(%arg0: i32) -> (i32, i32) {
    %c0_i32 = arith.constant 0 : i32
    %c0_i32_0 = arith.constant 0 : i32
    %c0_i32_1 = arith.constant 0 : i32
    return %c0_i32, %c0_i32_0 : i32, i32
  }
  func.func @transform_16(%arg0: i32) -> (i32, i32) {
    %c0_i32 = arith.constant 0 : i32
    %c0_i32_0 = arith.constant 0 : i32
    %c0_i32_1 = arith.constant 0 : i32
    return %c0_i32, %c0_i32_0 : i32, i32
  }
}

</mosaic_0001>

<bundles_post_ra>
// kernel: vit_rsnn_forward.4
= control target key start
LH: loop header
LB: loop body
LE: loop exit
PB: predicated region body
PF: predicated region fallthrough
CT: control target
= control target key end

     0   :  { %v132_v0 = vmov 0.0   ;;  %vm50_vm0 = vcmask 130048   ;;  %s216_s1 = inlined_call_operand.vmem [shape: f32[144,128], index: 1, kind: input, shape index: {}]   ;;  %s217_s0 = inlined_call_operand.vmem [shape: f32[2,144], index: 0, kind: input, shape index: {}]   ;;  %s218_s2 = inlined_call_operand.vmem [shape: f32[1,128], index: 2, kind: input, shape index: {}]   ;;  %s219_s3 = inlined_call_operand.vmem [shape: f32[2,128], index: 3, kind: output, shape index: {}]  }
   0x1   :  { %53 = vmatprep.subr.mxu0 %v132_v0  ;;  %v30_v1 = vld [vmem:[%s216_s1 + $0x78] sm:$0xff]  ;;  %v29_v2 = vld [vmem:[%s216_s1 + $0x70] sm:$0xff]  ;;  %v28_v3 = vld [vmem:[%s216_s1 + $0x68] sm:$0xff] }
   0x2   :  { %54 = vmatpush1.msra.mxu0 %v30_v1  ;;  %v27_v4 = vld [vmem:[%s216_s1 + $0x60] sm:$0xff]  ;;  %v26_v5 = vld [vmem:[%s216_s1 + $0x58] sm:$0xff]  ;;  %v25_v8 = vld [vmem:[%s216_s1 + $0x50] sm:$0xff] }
   0x3   :  { %55 = vmatprep.subr.mxu0 %v132_v0  ;;  %v129_v6 = vld.sshfl [vmem:[%s217_s0] sm:$0x33 pattern:$0x76325410]  ;;  %v24_v9 = vld [vmem:[%s216_s1 + $0x48] sm:$0xff]  ;;  %v22_v11 = vld [vmem:[%s216_s1 + $0x38] sm:$0xff] }
   0x4   :  { %56 = vmatpush1.msra.mxu0 %v29_v2  ;;  %v48_v7 = vcombine.high %v129_v6, %v129_v6  ;;  %v23_v10 = vld [vmem:[%s216_s1 + $0x40] sm:$0xff]  ;;  %v21_v12 = vld [vmem:[%s216_s1 + $0x30] sm:$0xff]  ;;  %v20_v13 = vld [vmem:[%s216_s1 + $0x28] sm:$0xff] }
   0x5   :  { %57 = vmatprep.subr.mxu0 %v132_v0  ;;  %v19_v14 = vld [vmem:[%s216_s1 + $0x20] sm:$0xff]  ;;  %v18_v15 = vld [vmem:[%s216_s1 + $0x18] sm:$0xff]  ;;  %v17_v16 = vld [vmem:[%s216_s1 + $0x10] sm:$0xff] }
   0x6   :  { %58 = vmatpush1.msra.mxu0 %v28_v3  ;;  %130 = vmatprep.mubr.msk.f32.mxu0 %vm50_vm0, %v48_v7  ;;  %v16_v17 = vld [vmem:[%s216_s1 + $0x8] sm:$0xff]  ;;  %v15_v18 = vld [vmem:[%s216_s1] sm:$0xff] }
   0x7   :  { %59 = vmatprep.subr.mxu0 %v132_v0  ;;  %v32_v19 = vld [vmem:[%s216_s1 + $0x88] sm:$0xff]  ;;  %v31_v20 = vld [vmem:[%s216_s1 + $0x80] sm:$0xff] }
   0x8   :  { %60 = vmatpush1.msra.mxu0 %v27_v4  ;;  %v128_v21 = vld [vmem:[%s218_s2] ss:$0 sm:$0xff] }
   0x9   :  { %61 = vmatprep.subr.mxu0 %v132_v0 }
   0xa   :  { %62 = vmatpush1.msra.mxu0 %v26_v5 }
   0xb   :  { %63 = vmatprep.subr.mxu0 %v132_v0 }
   0xc   :  { %64 = vmatpush1.msra.mxu0 %v25_v8 }
   0xd   :  { %65 = vmatprep.subr.mxu0 %v132_v0 }
   0xe   :  { %66 = vmatpush1.msra.mxu0 %v24_v9 }
   0xf   :  { %67 = vmatprep.subr.mxu0 %v132_v0 }
  0x10   :  { %68 = vmatpush1.msra.mxu0 %v23_v10 }
  0x11   :  { %69 = vmatprep.subr.mxu0 %v132_v0 }
  0x12   :  { %70 = vmatpush1.msra.mxu0 %v22_v11 }
  0x13   :  { %71 = vmatprep.subr.mxu0 %v132_v0 }
  0x14   :  { %72 = vmatpush1.msra.mxu0 %v21_v12 }
  0x15   :  { %73 = vmatprep.subr.mxu0 %v132_v0 }
  0x16   :  { %74 = vmatpush1.msra.mxu0 %v20_v13 }
  0x17   :  { %75 = vmatprep.subr.mxu0 %v132_v0 }
  0x18   :  { %76 = vmatpush1.msra.mxu0 %v19_v14 }
  0x19   :  { %77 = vmatprep.subr.mxu0 %v132_v0 }
  0x1a   :  { %78 = vmatpush1.msra.mxu0 %v18_v15 }
  0x1b   :  { %79 = vmatprep.subr.mxu0 %v132_v0 }
  0x1c   :  { %80 = vmatpush1.msra.mxu0 %v17_v16 }
  0x1d   :  { %81 = vmatprep.subr.mxu0 %v132_v0 }
  0x1e   :  { %82 = vmatpush1.msra.mxu0 %v16_v17 }
  0x1f   :  { %83 = vmatprep.subr.mxu0 %v132_v0 }
  0x20   :  { %84 = vmatpush1.msra.mxu0 %v15_v18 }
  0x21   :  { %113 = vmatprep.subr.mxu0 %v132_v0 }
  0x22   :  { %114 = vmatpush2.msra.mxu0 %v32_v19 }
  0x23   :  { %115 = vmatprep.subr.mxu0 %v132_v0 }
  0x24   :  { %116 = vmatpush2.msra.mxu0 %v31_v20 }
  0x25   :  { %118 = vmatmul.mubr.f32.vlgmr.msra.gmra.mxu0 %v129_v6 }
  0xe5   :  { %v119_v22 = vpop.f32.mrf.mxu0 }
  0xe6   :  { %v120_v23 = vadd.f32 %v128_v21, %v119_v22 }
  0xe7   :  { %v121_v24 = vpop.f32.mrf.mxu0 }
  0xe8   :  { %123 = vst [vmem:[%s219_s3] sm:$0x3] %v120_v23 }

// kernel: vit_rsnn_forward.3
= control target key start
LH: loop header
LB: loop body
LE: loop exit
PB: predicated region body
PF: predicated region fallthrough
CT: control target
= control target key end

     0   :  { %v189_v0 = vmov 0.0   ;;  %vm32_vm0 = vcmask 523264   ;;  %vm190_vm1 = vmmov 0   ;;  %vm122_vm2 = vcmask 130048   ;;  %s256_s1 = inlined_call_operand.vmem [shape: f32[64,16], index: 1, kind: input, shape index: {}]   ;;  %s257_s0 = inlined_call_operand.vmem [shape: f32[18,64], index: 0, kind: input, shape index: {}]   ;;  %s258_s2 = inlined_call_operand.vmem [shape: f32[1,16], index: 2, kind: input, shape index: {}]   ;;  %s259_s3 = inlined_call_operand.vmem [shape: f32[18,16], index: 3, kind: output, shape index: {}]  }
   0x1   :  { %171 = vmatprep.subr.mxu1 %v189_v0  ;;  %v24_v1 = vld [vmem:[%s256_s1 + $0x38] sm:$0xff]  ;;  %146 = vmatprep.subr.mxu0 %v189_v0  ;;  %v23_v2 = vld [vmem:[%s256_s1 + $0x30] sm:$0xff]  ;;  %v22_v3 = vld [vmem:[%s256_s1 + $0x28] sm:$0xff]  ;;  %vm125_vm3 = vcmask 123904  }
   0x2   :  { %179 = vmatpush3.msra.mxu1 %v24_v1  ;;  %147 = vmatpush3.msra.mxu0 %v24_v1  ;;  %v21_v4 = vld [vmem:[%s256_s1 + $0x20] sm:$0xff]  ;;  %v20_v5 = vld [vmem:[%s256_s1 + $0x18] sm:$0xff]  ;;  %v19_v6 = vld [vmem:[%s256_s1 + $0x10] sm:$0xff] }
   0x3   :  { %172 = vmatprep.subr.mxu1 %v189_v0  ;;  %148 = vmatprep.subr.mxu0 %v189_v0  ;;  %v18_v7 = vld [vmem:[%s256_s1 + $0x8] sm:$0xff]  ;;  %v17_v8 = vld [vmem:[%s256_s1] sm:$0xff]  ;;  %v16_v11 = vld [vmem:[%s257_s0 + $0x10] sm:$0x3] }
   0x4   :  { %180 = vmatpush3.msra.mxu1 %v23_v2  ;;  %149 = vmatpush3.msra.mxu0 %v23_v2  ;;  %v15_v9 = vld [vmem:[%s257_s0 + $0x8] sm:$0xff]  ;;  %v14_v10 = vld [vmem:[%s257_s0] sm:$0xff] }
   0x5   :  { %173 = vmatprep.subr.mxu1 %v189_v0  ;;  %150 = vmatprep.subr.mxu0 %v189_v0  ;;  %v131_v12 = vld [vmem:[%s258_s2] ss:$0 sm:$0xff] }
   0x6   :  { %181 = vmatpush3.msra.mxu1 %v22_v3  ;;  %151 = vmatpush3.msra.mxu0 %v22_v3 }
   0x7   :  { %174 = vmatprep.subr.mxu1 %v189_v0  ;;  %152 = vmatprep.subr.mxu0 %v189_v0 }
   0x8   :  { %182 = vmatpush3.msra.mxu1 %v21_v4  ;;  %153 = vmatpush3.msra.mxu0 %v21_v4 }
   0x9   :  { %175 = vmatprep.subr.mxu1 %v189_v0  ;;  %154 = vmatprep.subr.mxu0 %v189_v0 }
   0xa   :  { %183 = vmatpush3.msra.mxu1 %v20_v5  ;;  %155 = vmatpush3.msra.mxu0 %v20_v5 }
   0xb   :  { %176 = vmatprep.subr.mxu1 %v189_v0  ;;  %156 = vmatprep.subr.mxu0 %v189_v0 }
   0xc   :  { %184 = vmatpush3.msra.mxu1 %v19_v6  ;;  %157 = vmatpush3.msra.mxu0 %v19_v6 }
   0xd   :  { %177 = vmatprep.subr.mxu1 %v189_v0  ;;  %158 = vmatprep.subr.mxu0 %v189_v0 }
   0xe   :  { %185 = vmatpush3.msra.mxu1 %v18_v7  ;;  %159 = vmatpush3.msra.mxu0 %v18_v7 }
   0xf   :  { %178 = vmatprep.subr.mxu1 %v189_v0  ;;  %165 = vmatprep.mubr.msk.f32.mxu1 %vm190_vm1, %v189_v0 }
  0x10   :  { %186 = vmatpush3.msra.mxu1 %v17_v8  ;;  %160 = vmatprep.subr.mxu0 %v189_v0 }
  0x11   :  { %166 = vmatmul.mubr.msk.f32.vlgmr.msra.gmra.mxu1 %vm32_vm0, %v15_v9  ;;  %161 = vmatpush3.msra.mxu0 %v17_v8 }
  0x12   :  { %162 = vmatprep.mubr.msk.f32.mxu0 %vm190_vm1, %v189_v0  ;;  %168 = vmatprep.mubr.msk.f32.mxu1 %vm190_vm1, %v189_v0 }
  0x13   :  { %163 = vmatmul.mubr.msk.f32.vlgmr.msra.gmra.mxu0 %vm32_vm0, %v14_v10 }
  0x15   :  { %169 = vmatmul.mubr.msk.f32.gmra.mxu1 %vm32_vm0, %v16_v11 }
  0xd1   :  { %v113_v13 = vpop.f32.mrf.mxu1 }
  0xd2   :  { %v114_v14 = vadd.f32 %v131_v12, %v113_v13 }
  0xd3   :  { %v108_v15 = vpop.f32.mrf.mxu0  ;;  %v167_v16 = vpop.f32.mrf.mxu1 }
  0xd4   :  { %124 = vst.msk [vmem:[%s259_s3 + $0x8] sm:$0xff] %vm122_vm2, %v114_v14  ;;  %v109_v17 = vadd.f32 %v131_v12, %v108_v15 }
  0xd5   :  { %v164_v18 = vpop.f32.mrf.mxu0  ;;  %v118_v19 = vpop.f32.mrf.mxu1 }
  0xd6   :  { %123 = vst.msk [vmem:[%s259_s3] sm:$0xff] %vm122_vm2, %v109_v17  ;;  %v119_v20 = vadd.f32 %v131_v12, %v118_v19 }
  0xd7   :  { %v170_v21 = vpop.f32.mrf.mxu1 }
  0xd8   :  { %126 = vst.msk [vmem:[%s259_s3 + $0x10] sm:$0x3] %vm125_vm3, %v119_v20 }

// kernel: vit_rsnn_forward.5
= control target key start
LH: loop header
LB: loop body
LE: loop exit
PB: predicated region body
PF: predicated region fallthrough
CT: control target
= control target key end

     0   :  { %s3376_s0 = inlined_call_operand.vmem [shape: f32[2,128], index: 0, kind: input, shape index: {}]   ;;  %s3377_s1 = inlined_call_operand.vmem [shape: f32[128,128], index: 1, kind: input, shape index: {}]   ;;  %s3378_s2 = inlined_call_operand.vmem [shape: f32[1,128], index: 2, kind: input, shape index: {}]   ;;  %s3379_s3 = inlined_call_operand.vmem [shape: f32[128,128], index: 3, kind: input, shape index: {}]   ;;  %s3380_s4 = inlined_call_operand.vmem [shape: f32[1,128], index: 4, kind: input, shape index: {}]   ;;  %s3381_s5 = inlined_call_operand.vmem [shape: f32[128,32], index: 5, kind: input, shape index: {}]   ;;  %s3382_s6 = inlined_call_operand.vmem [shape: f32[1,32], index: 6, kind: input, shape index: {}]   ;;  %s3383_s7 = inlined_call_operand.vmem [shape: f32[32,32], index: 7, kind: input, shape index: {}]   ;;  %s3384_s8 = inlined_call_operand.vmem [shape: f32[1,32], index: 8, kind: input, shape index: {}]   ;;  %s3385_s9 = inlined_call_operand.vmem [shape: f32[32,128], index: 9, kind: input, shape index: {}]   ;;  %s3386_s10 = inlined_call_operand.vmem [shape: f32[1,128], index: 10, kind: input, shape index: {}]   ;;  %s3387_s11 = inlined_call_operand.vmem [shape: f32[128,256], index: 11, kind: input, shape index: {}]   ;;  %s3388_s12 = inlined_call_operand.vmem [shape: f32[1,256], index: 12, kind: input, shape index: {}]   ;;  %s3389_s13 = inlined_call_operand.vmem [shape: f32[128,128], index: 13, kind: input, shape index: {}]   ;;  %s3390_s14 = inlined_call_operand.vmem [shape: f32[1,128], index: 14, kind: input, shape index: {}]   ;;  %s3391_s15 = inlined_call_operand.vmem [shape: f32[2,128], index: 15, kind: output, shape index: {0}]   ;;  %s3392_s16 = inlined_call_operand.hbm [shape: f32[1,1], index: 16, kind: output, shape index: {1}]  }
   0x1   :  { %3393 = sst [smem:[#allocation16_spill]] %s3376_s0 }
   0x2   :  { %22 = vsyncpa [#allocation14], 0  ;;  %s2494_s21 = smov 0  }
   0x3 LB: > { %s2500_s22 = sadd.s32 4294967295, %s2402_s21   ;;  %p1903_p0 = scmp.ge.s32.totalorder %s2402_s21, 1  ;;  %s2402_s21 = sphi %s2494_s21, %s28_s21  }
   0x4   : > { %p446_p1 = scmp.lt.s32.totalorder %s2402_s21, 4 }
   0x6   : > { %p447_p2 = pnand %p1903_p0, %p446_p1 }
   0x7   : > { %p1904_p3 = scmp.ne.s32.totalorder (!%p447_p2), %s2500_s22, 0 }
   0x8   : > { %450 = sbr.rel (%p447_p2) target bundleno = 1562 (0x61a), region = 80 }
   0xd   : > { %489 = sbr.rel (%p1904_p3) target bundleno = 25 (0x19), region = 84 }
  0x12   : > { %vm493_vm0 = vcmask 254976   ;;  %vm498_vm1 = vcmask 0   ;;  %v2404_v0 = vmov 0.0  }
  0x13   : > { %490 = vst [vmem:[#allocation2] sm:$0x3] %v2404_v0  ;;  %491 = vst [vmem:[#allocation3] sm:$0x3] %v2404_v0 }
  0x14   : > { %492 = vst [vmem:[#allocation4] sm:$0x3] %v2404_v0  ;;  %496 = vst [vmem:[#allocation7] sm:$0x3] %v2404_v0 }
  0x15   : > { %497 = vst [vmem:[#allocation9] sm:$0x3] %v2404_v0  ;;  %494 = vst.msk [vmem:[#allocation5] sm:$0x3] %vm493_vm0, %v2404_v0 }
  0x16   : > { %495 = vst.msk [vmem:[#allocation6] sm:$0x3] %vm493_vm0, %v2404_v0 }
  0x17   : > { %499 = vst.msk [vmem:[#allocation10] sm:$0x1] %vm498_vm1, %v2404_v0  ;;  %500 = vst.msk [vmem:[#allocation11] sm:$0x1] %vm498_vm1, %v2404_v0 }
  0x18   : > { %501 = vst.msk [vmem:[#allocation12] sm:$0x1] %vm498_vm1, %v2404_v0 }
  0x19 PF: > { %v533_v1 = vld [vmem:[%s3377_s1 + $0x78] sm:$0xff]  ;;  %v2405_v2 = vmov 0.0   ;;  %v532_v3 = vld [vmem:[%s3377_s1 + $0x70] sm:$0xff]  ;;  %vm2406_vm2 = vmmov 0   ;;  %v531_v4 = vld [vmem:[%s3377_s1 + $0x68] sm:$0xff]  ;;  %s3394_s18 = sld [smem:[#allocation16_spill]] }
  0x1a   : > { %2049 = vmatprep.subr.mxu0 %v2405_v2  ;;  %2081 = vmatprep.mubr.msk.f32.mxu0 %vm2406_vm2, %v2405_v2  ;;  %v530_v5 = vld [vmem:[%s3377_s1 + $0x60] sm:$0xff]  ;;  %v635_v9 = vld [vmem:[%s3379_s3 + $0x78] sm:$0xff]  ;;  %v634_v10 = vld [vmem:[%s3379_s3 + $0x70] sm:$0xff]  ;;  %v2407_v41 = vmov 1.0   ;;  %vm827_vm8 = vcmask 261120   ;;  %vm910_vm11 = vcmask 254976  }
  0x1b   : > { %2050 = vmatpush3.msra.mxu0 %v533_v1  ;;  %2084 = vmatprep.subr.mxu1 %v2405_v2  ;;  %v503_v7 = vld [vmem:[#allocation2] sm:$0x3]  ;;  %v529_v11 = vld [vmem:[%s3377_s1 + $0x58] sm:$0xff]  ;;  %v633_v14 = vld [vmem:[%s3379_s3 + $0x68] sm:$0xff]  ;;  %p1842_p4 = scmp.gt.s32.totalorder %s2500_s22, 0  ;;  %s2408_s30 = smov [#allocation13]  }
  0x1c   : > { %2051 = vmatprep.subr.mxu0 %v2405_v2  ;;  %2116 = vmatprep.mubr.msk.f32.mxu1 %vm2406_vm2, %v2405_v2  ;;  %vm504_vm3 = vcmp.gt.f32.partialorder %v503_v7, 0.5  ;;  %v506_v8 = vmul.f32 0.8, %v503_v7  ;;  %v528_v15 = vld [vmem:[%s3377_s1 + $0x50] sm:$0xff]  ;;  %v632_v17 = vld [vmem:[%s3379_s3 + $0x60] sm:$0xff]  ;;  %v527_v18 = vld [vmem:[%s3377_s1 + $0x48] sm:$0xff] }
  0x1d   : > { %2052 = vmatpush3.msra.mxu0 %v532_v3  ;;  %v505_v12 = vsel %vm504_vm3, 0.5, %v2405_v2  ;;  %2085 = vmatpush3.msra.mxu1 %v635_v9  ;;  %v631_v20 = vld [vmem:[%s3379_s3 + $0x58] sm:$0xff]  ;;  %v526_v21 = vld [vmem:[%s3377_s1 + $0x40] sm:$0xff]  ;;  %v630_v24 = vld [vmem:[%s3379_s3 + $0x50] sm:$0xff]  ;;  %s1846_s29 = scalar_select %p1842_p4, 1, 0 }
  0x1e   : > { %2053 = vmatprep.subr.mxu0 %v2405_v2  ;;  %2086 = vmatprep.subr.mxu1 %v2405_v2  ;;  %v525_v25 = vld [vmem:[%s3377_s1 + $0x38] sm:$0xff]  ;;  %v629_v27 = vld [vmem:[%s3379_s3 + $0x48] sm:$0xff]  ;;  %v524_v28 = vld [vmem:[%s3377_s1 + $0x30] sm:$0xff]  ;;  %s1871_s0 = sshll.u32 %s2408_s30, 4  ;;  %p2285_p5 = scmp.eq.s32.totalorder %s2500_s22, 2  ;;  %s1872_s0 = int_to_ptr.vmem [resolvable:$true] %s1871_s0 }
  0x1f   : > { %v502_v6 = vld [vmem:[%s3394_s18] sm:$0x3]  ;;  %2054 = vmatpush3.msra.mxu0 %v531_v4  ;;  %2087 = vmatpush3.msra.mxu1 %v634_v10  ;;  %v523_v30 = vld [vmem:[%s3377_s1 + $0x28] sm:$0xff]  ;;  %v627_v31 = vld [vmem:[%s3379_s3 + $0x38] sm:$0xff]  ;;  %s2368_s17 = scalar_lea.vmem %s1872_s0, 16  ;;  %s2374_s18 = scalar_lea.vmem %s1872_s0, 32 }
  0x20   : > { %2055 = vmatprep.subr.mxu0 %v2405_v2  ;;  %v507_v13 = vadd.f32 %v506_v8, %v502_v6  ;;  %2088 = vmatprep.subr.mxu1 %v2405_v2  ;;  %v628_v29 = vld [vmem:[%s3379_s3 + $0x40] sm:$0xff]  ;;  %v626_v33 = vld [vmem:[%s3379_s3 + $0x30] sm:$0xff]  ;;  %v521_v34 = vld [vmem:[%s3377_s1 + $0x18] sm:$0xff]  ;;  %p2369_p6 = scmp.ne.s32.totalorder %s1872_s0, %s2368_s17  ;;  %p2375_p9 = scmp.lt.s32.totalorder %s1872_s0, %s1872_s0 }
  0x21   : > { %2056 = vmatpush3.msra.mxu0 %v530_v5  ;;  %2089 = vmatpush3.msra.mxu1 %v633_v14  ;;  %v522_v32 = vld [vmem:[%s3377_s1 + $0x20] sm:$0xff]  ;;  %v625_v35 = vld [vmem:[%s3379_s3 + $0x28] sm:$0xff]  ;;  %v520_v36 = vld [vmem:[%s3377_s1 + $0x10] sm:$0xff]  ;;  %p2376_p10 = scmp.lt.s32.totalorder %s2374_s18, %s2368_s17 }
  0x22   : > { %2057 = vmatprep.subr.mxu0 %v2405_v2  ;;  %v2547_v16 = vsub.f32 %v507_v13, %v505_v12  ;;  %2090 = vmatprep.subr.mxu1 %v2405_v2  ;;  %v624_v37 = vld [vmem:[%s3379_s3 + $0x20] sm:$0xff]  ;;  %v519_v38 = vld [vmem:[%s3377_s1 + $0x8] sm:$0xff]  ;;  %v737_v40 = vld [vmem:[%s3381_s5 + $0x78] sm:$0xff]  ;;  %p2370_p7 = pnand %p2369_p6, %p2285_p5 }
  0x23   : > { %2058 = vmatpush3.msra.mxu0 %v529_v11  ;;  %2091 = vmatpush3.msra.mxu1 %v632_v17  ;;  %v518_v39 = vld [vmem:[%s3377_s1] sm:$0xff]  ;;  %v736_v42 = vld [vmem:[%s3381_s5 + $0x70] sm:$0xff]  ;;  %v735_v43 = vld [vmem:[%s3381_s5 + $0x68] sm:$0xff]  ;;  %p2377_p11 = por %p2376_p10, %p2375_p9 }
  0x24   : > { %2059 = vmatprep.subr.mxu0 %v2405_v2  ;;  %vm509_vm4 = vcmp.gt.f32.partialorder %v2547_v16, 0.5  ;;  %v512_v19 = vmul.f32 0.8, %v2547_v16  ;;  %2092 = vmatprep.subr.mxu1 %v2405_v2  ;;  %v734_v44 = vld [vmem:[%s3381_s5 + $0x60] sm:$0xff]  ;;  %v733_v45 = vld [vmem:[%s3381_s5 + $0x58] sm:$0xff]  ;;  %v732_v46 = vld [vmem:[%s3381_s5 + $0x50] sm:$0xff]  ;;  %p2371_p8 = pneg %p2370_p7 }
  0x25   : > { %2060 = vmatpush3.msra.mxu0 %v528_v15  ;;  %v511_v22 = vsel %vm509_vm4, 0.5, %v2405_v2  ;;  %2093 = vmatpush3.msra.mxu1 %v631_v20  ;;  %v731_v47 = vld [vmem:[%s3381_s5 + $0x48] sm:$0xff]  ;;  %v730_v48 = vld [vmem:[%s3381_s5 + $0x40] sm:$0xff]  ;;  %v729_v49 = vld [vmem:[%s3381_s5 + $0x38] sm:$0xff] }
  0x26   : > { %2061 = vmatprep.subr.mxu0 %v2405_v2  ;;  %v513_v23 = vadd.f32 %v512_v19, %v502_v6  ;;  %2094 = vmatprep.subr.mxu1 %v2405_v2  ;;  %v728_v50 = vld [vmem:[%s3381_s5 + $0x30] sm:$0xff]  ;;  %v623_v51 = vld [vmem:[%s3379_s3 + $0x18] sm:$0xff]  ;;  %v727_v52 = vld [vmem:[%s3381_s5 + $0x28] sm:$0xff]  ;;  %p2378_p12 = pnand %p2377_p11, %p2371_p8 }
  0x27   : > { %2062 = vmatpush3.msra.mxu0 %v527_v18  ;;  %2095 = vmatpush3.msra.mxu1 %v630_v24  ;;  %v622_v53 = vld [vmem:[%s3379_s3 + $0x10] sm:$0xff]  ;;  %v726_v54 = vld [vmem:[%s3381_s5 + $0x20] sm:$0xff]  ;;  %v621_v55 = vld [vmem:[%s3379_s3 + $0x8] sm:$0xff] }
  0x28   : > { %2063 = vmatprep.subr.mxu0 %v2405_v2  ;;  %v514_v26 = vsub.f32 %v513_v23, %v511_v22  ;;  %2096 = vmatprep.subr.mxu1 %v2405_v2  ;;  %v725_v56 = vld [vmem:[%s3381_s5 + $0x18] sm:$0xff]  ;;  %v620_v57 = vld [vmem:[%s3379_s3] sm:$0xff]  ;;  %v724_v58 = vld [vmem:[%s3381_s5 + $0x10] sm:$0xff] }
  0x29   : > { %2064 = vmatpush3.msra.mxu0 %v526_v21  ;;  %2097 = vmatpush3.msra.mxu1 %v629_v27  ;;  %v723_v59 = vld [vmem:[%s3381_s5 + $0x8] sm:$0xff]  ;;  %v722_v60 = vld [vmem:[%s3381_s5] sm:$0xff]  ;;  %v819_v7 = vld [vmem:[%s3383_s7 + $0x18] sm:$0xff] }
  0x2a   : > { %2065 = vmatprep.subr.mxu0 %v2405_v2  ;;  %517 = vst [vmem:[#allocation2] sm:$0x3] %v514_v26  ;;  %2098 = vmatprep.subr.mxu1 %v2405_v2  ;;  %vm515_vm5 = vcmp.gt.f32.partialorder %v514_v26, 0.5  ;;  %v611_v61 = vld [vmem:[#allocation3] sm:$0x3]  ;;  %v818_v8 = vld [vmem:[%s3383_s7 + $0x10] sm:$0xff] }
  0x2b   : > { %2066 = vmatpush3.msra.mxu0 %v525_v25  ;;  %2099 = vmatpush3.msra.mxu1 %v628_v29  ;;  %v1905_v62 = vld [vmem:[%s3378_s2] ss:$0 sm:$0xff]  ;;  %vm612_vm6 = vcmp.gt.f32.partialorder %v611_v61, 0.5  ;;  %v614_v63 = vmul.f32 0.8, %v611_v61  ;;  %v817_v9 = vld [vmem:[%s3383_s7 + $0x8] sm:$0xff] }
  0x2c   : > { %2067 = vmatprep.subr.mxu0 %v2405_v2  ;;  %2100 = vmatprep.subr.mxu1 %v2405_v2  ;;  %v613_v3 = vsel %vm612_vm6, 0.5, %v2405_v2  ;;  %v816_v10 = vld [vmem:[%s3383_s7] sm:$0xff]  ;;  %v815_v11 = vld [vmem:[#allocation6] sm:$0x3]  ;;  %v916_v14 = vld [vmem:[%s3385_s9 + $0x18] sm:$0xff] }
  0x2d   : > { %2068 = vmatpush3.msra.mxu0 %v524_v28  ;;  %2101 = vmatpush3.msra.mxu1 %v627_v31  ;;  %v915_v15 = vld [vmem:[%s3385_s9 + $0x10] sm:$0xff]  ;;  %v914_v17 = vld [vmem:[%s3385_s9 + $0x8] sm:$0xff]  ;;  %v913_v18 = vld [vmem:[%s3385_s9] sm:$0xff] }
  0x2e   : > { %2069 = vmatprep.subr.mxu0 %v2405_v2  ;;  %2102 = vmatprep.subr.mxu1 %v2405_v2  ;;  %v1028_v19 = vld [vmem:[%s3387_s11 + $0xf8] sm:$0xff]  ;;  %v713_v20 = vld [vmem:[#allocation4] sm:$0x3]  ;;  %v1907_v21 = vld [vmem:[%s3380_s4] ss:$0 sm:$0xff] }
  0x2f   : > { %2070 = vmatpush3.msra.mxu0 %v523_v30  ;;  %2103 = vmatpush3.msra.mxu1 %v626_v33  ;;  %vm714_vm9 = vcmp.gt.f32.partialorder %v713_v20, 0.5  ;;  %v716_v22 = vmul.f32 0.8, %v713_v20  ;;  %v1909_v24 = vld [vmem:[%s3382_s6] ss:$0 sm:$0xff]  ;;  %v1010_v61 = vld [vmem:[%s3387_s11 + $0x68] sm:$0xff] }
  0x30   : > { %2071 = vmatprep.subr.mxu0 %v2405_v2  ;;  %2104 = vmatprep.subr.mxu1 %v2405_v2  ;;  %v901_v25 = vld [vmem:[#allocation5] sm:$0x3]  ;;  %v715_v27 = vsel %vm714_vm9, 0.5, %v2405_v2  ;;  %v1911_v33 = vld [vmem:[%s3384_s8] ss:$0 sm:$0xff] }
  0x31   : > { %2072 = vmatpush3.msra.mxu0 %v522_v32  ;;  %2105 = vmatpush3.msra.mxu1 %v625_v35  ;;  %v904_v31 = vmul.f32 0.95, %v901_v25  ;;  %vm902_vm10 = vcmp.gt.f32.partialorder %v901_v25, 1.0 }
  0x32   : > { %2073 = vmatprep.subr.mxu0 %v2405_v2  ;;  %2106 = vmatprep.subr.mxu1 %v2405_v2 }
  0x33   : > { %2074 = vmatpush3.msra.mxu0 %v521_v34  ;;  %2107 = vmatpush3.msra.mxu1 %v624_v37  ;;  %v903_v37 = vsel %vm902_vm10, 1.0, %v2405_v2 }
  0x34   : > { %2075 = vmatprep.subr.mxu0 %v2405_v2  ;;  %2108 = vmatprep.subr.mxu1 %v2405_v2 }
  0x35   : > { %2076 = vmatpush3.msra.mxu0 %v520_v36  ;;  %2109 = vmatpush3.msra.mxu1 %v623_v51  ;;  %v1020_v51 = vld [vmem:[%s3387_s11 + $0xb8] sm:$0xff] }
  0x36   : > { %2077 = vmatprep.subr.mxu0 %v2405_v2  ;;  %2110 = vmatprep.subr.mxu1 %v2405_v2 }
  0x37   : > { %2078 = vmatpush3.msra.mxu0 %v519_v38  ;;  %2111 = vmatpush3.msra.mxu1 %v622_v53  ;;  %v1018_v53 = vld [vmem:[%s3387_s11 + $0xa8] sm:$0xff] }
  0x38   : > { %2079 = vmatprep.subr.mxu0 %v2405_v2  ;;  %2112 = vmatprep.subr.mxu1 %v2405_v2 }
  0x39   : > { %2080 = vmatpush3.msra.mxu0 %v518_v39  ;;  %2113 = vmatpush3.msra.mxu1 %v621_v55  ;;  %v1016_v55 = vld [vmem:[%s3387_s11 + $0x98] sm:$0xff] }
  0x3a   : > { %2082 = vmatmul.mubr.msk.f32.vlgmr.msra.gmra.mxu0 %vm515_vm5, %v2407_v41  ;;  %2119 = vmatprep.subr.mxu0 %v2405_v2 }
  0x3b   : > { %2120 = vmatpush3.msra.mxu0 %v737_v40  ;;  %2151 = vmatprep.mubr.msk.f32.mxu0 %vm2406_vm2, %v2405_v2 }
  0x3c   : > { %2121 = vmatprep.subr.mxu0 %v2405_v2  ;;  %2114 = vmatprep.subr.mxu1 %v2405_v2 }
  0x3d   : > { %2122 = vmatpush3.msra.mxu0 %v736_v42  ;;  %2115 = vmatpush3.msra.mxu1 %v620_v57  ;;  %v1027_v42 = vld [vmem:[%s3387_s11 + $0xf0] sm:$0xff]  ;;  %v1014_v57 = vld [vmem:[%s3387_s11 + $0x88] sm:$0xff] }
  0x3e   : > { %2123 = vmatprep.subr.mxu0 %v2405_v2  ;;  %2154 = vmatprep.subr.mxu1 %v2405_v2 }
  0x3f   : > { %2124 = vmatpush3.msra.mxu0 %v735_v43 }
  0x40   : > { %2125 = vmatprep.subr.mxu0 %v2405_v2 }
  0x41   : > { %2126 = vmatpush3.msra.mxu0 %v734_v44  ;;  %v1026_v44 = vld [vmem:[%s3387_s11 + $0xe8] sm:$0xff] }
  0x42   : > { %2127 = vmatprep.subr.mxu0 %v2405_v2 }
  0x43   : > { %2128 = vmatpush3.msra.mxu0 %v733_v45  ;;  %v1025_v45 = vld [vmem:[%s3387_s11 + $0xe0] sm:$0xff] }
  0x44   : > { %2129 = vmatprep.subr.mxu0 %v2405_v2 }
  0x45   : > { %2130 = vmatpush3.msra.mxu0 %v732_v46 }
  0x46   : > { %2131 = vmatprep.subr.mxu0 %v2405_v2 }
  0x47   : > { %2132 = vmatpush3.msra.mxu0 %v731_v47  ;;  %v1024_v47 = vld [vmem:[%s3387_s11 + $0xd8] sm:$0xff] }
  0x48   : > { %2133 = vmatprep.subr.mxu0 %v2405_v2 }
  0x49   : > { %2134 = vmatpush3.msra.mxu0 %v730_v48  ;;  %v1023_v48 = vld [vmem:[%s3387_s11 + $0xd0] sm:$0xff] }
  0x4a   : > { %2135 = vmatprep.subr.mxu0 %v2405_v2 }
  0x4b   : > { %2136 = vmatpush3.msra.mxu0 %v729_v49  ;;  %v1022_v49 = vld [vmem:[%s3387_s11 + $0xc8] sm:$0xff] }
  0x4c   : > { %2137 = vmatprep.subr.mxu0 %v2405_v2 }
  0x4d   : > { %2138 = vmatpush3.msra.mxu0 %v728_v50  ;;  %v1021_v50 = vld [vmem:[%s3387_s11 + $0xc0] sm:$0xff] }
  0x4e   : > { %2139 = vmatprep.subr.mxu0 %v2405_v2 }
  0x4f   : > { %2140 = vmatpush3.msra.mxu0 %v727_v52  ;;  %v1019_v52 = vld [vmem:[%s3387_s11 + $0xb0] sm:$0xff] }
  0x50   : > { %2141 = vmatprep.subr.mxu0 %v2405_v2 }
  0x51   : > { %2142 = vmatpush3.msra.mxu0 %v726_v54  ;;  %v1017_v54 = vld [vmem:[%s3387_s11 + $0xa0] sm:$0xff] }
  0x52   : > { %2143 = vmatprep.subr.mxu0 %v2405_v2 }
  0x53   : > { %2144 = vmatpush3.msra.mxu0 %v725_v56  ;;  %v1015_v56 = vld [vmem:[%s3387_s11 + $0x90] sm:$0xff] }
  0x54   : > { %2145 = vmatprep.subr.mxu0 %v2405_v2 }
  0x55   : > { %2146 = vmatpush3.msra.mxu0 %v724_v58  ;;  %v1013_v58 = vld [vmem:[%s3387_s11 + $0x80] sm:$0xff] }
  0x56   : > { %2147 = vmatprep.subr.mxu0 %v2405_v2 }
  0x57   : > { %2148 = vmatpush3.msra.mxu0 %v723_v59  ;;  %v1012_v59 = vld [vmem:[%s3387_s11 + $0x78] sm:$0xff] }
  0x58   : > { %2149 = vmatprep.subr.mxu0 %v2405_v2 }
  0x59   : > { %2150 = vmatpush3.msra.mxu0 %v722_v60  ;;  %v1011_v60 = vld [vmem:[%s3387_s11 + $0x70] sm:$0xff] }
  0x5a   : > { %2152 = vmatmul.mubr.msk.f32.vlgmr.msra.gmra.mxu0 %vm509_vm4, %v2407_v41  ;;  %2176 = vmatprep.subr.mxu0 %v2405_v2 }
  0x5b   : > { %2208 = vmatprep.mubr.msk.f32.mxu0 %vm2406_vm2, %v2405_v2 }
  0xfa   : > { %v607_v0 = vpop.f32.mrf.mxu0 }
  0xfb   : > { %v608_v1 = vadd.f32 %v1905_v62, %v607_v0  ;;  %v1009_v62 = vld [vmem:[%s3387_s11 + $0x60] sm:$0xff]  ;;  %v1007_v0 = vld [vmem:[%s3387_s11 + $0x50] sm:$0xff] }
  0xfc   : > { %v2083_v4 = vpop.f32.mrf.mxu0 }
  0xfd   : > { %v615_v5 = vadd.f32 %v614_v63, %v608_v1  ;;  %v1008_v63 = vld [vmem:[%s3387_s11 + $0x58] sm:$0xff]  ;;  %v1006_v1 = vld [vmem:[%s3387_s11 + $0x48] sm:$0xff] }
  0xfe   : > { %v1004_v4 = vld [vmem:[%s3387_s11 + $0x38] sm:$0xff] }
  0xff   : > { %v616_v6 = vsub.f32 %v615_v5, %v613_v3  ;;  %v1005_v3 = vld [vmem:[%s3387_s11 + $0x40] sm:$0xff]  ;;  %v1003_v5 = vld [vmem:[%s3387_s11 + $0x30] sm:$0xff] }
 0x101   : > { %619 = vst [vmem:[#allocation3] sm:$0x3] %v616_v6  ;;  %vm617_vm7 = vcmp.gt.f32.partialorder %v616_v6, 0.5  ;;  %v1002_v6 = vld [vmem:[%s3387_s11 + $0x28] sm:$0xff] }
 0x102   : > { %2117 = vmatmul.mubr.msk.f32.vlgmr.msra.gmra.mxu1 %vm617_vm7, %v2407_v41 }
 0x103   : > { %2155 = vmatpush3.msra.mxu1 %v819_v7  ;;  %2162 = vmatprep.mubr.msk.f32.mxu1 %vm2406_vm2, %v2405_v2  ;;  %v1001_v7 = vld [vmem:[%s3387_s11 + $0x20] sm:$0xff] }
 0x104   : > { %2156 = vmatprep.subr.mxu1 %v2405_v2 }
 0x105   : > { %2157 = vmatpush3.msra.mxu1 %v818_v8  ;;  %v1000_v8 = vld [vmem:[%s3387_s11 + $0x18] sm:$0xff] }
 0x106   : > { %2158 = vmatprep.subr.mxu1 %v2405_v2 }
 0x107   : > { %2159 = vmatpush3.msra.mxu1 %v817_v9  ;;  %v999_v9 = vld [vmem:[%s3387_s11 + $0x10] sm:$0xff] }
 0x108   : > { %2160 = vmatprep.subr.mxu1 %v2405_v2 }
 0x109   : > { %2161 = vmatpush3.msra.mxu1 %v816_v10  ;;  %v998_v10 = vld [vmem:[%s3387_s11 + $0x8] sm:$0xff] }
 0x10a   : > { %2163 = vmatmul.mubr.msk.f32.vlgmr.msra.gmra.mxu1 %vm827_vm8, %v815_v11  ;;  %2165 = vmatprep.subr.mxu1 %v2405_v2  ;;  %v997_v11 = vld [vmem:[%s3387_s11] sm:$0xff] }
 0x10b   : > { %2173 = vmatprep.mubr.msk.f32.mxu1 %vm2406_vm2, %v2405_v2  ;;  %2166 = vmatpush3.msra.mxu1 %v916_v14  ;;  %v1031_v14 = vlaneseq }
 0x10c   : > { %2167 = vmatprep.subr.mxu1 %v2405_v2 }
 0x10d   : > { %2168 = vmatpush3.msra.mxu1 %v915_v15  ;;  %v2887_v15 = vshrl.u32 %v1031_v14, 7 }
 0x10e   : > { %2169 = vmatprep.subr.mxu1 %v2405_v2 }
 0x10f   : > { %2170 = vmatpush3.msra.mxu1 %v914_v17  ;;  %v2892_v17 = vld [vmem:[%s3388_s12] sm:$0x3] }
 0x110   : > { %2171 = vmatprep.subr.mxu1 %v2405_v2 }
 0x111   : > { %2172 = vmatpush3.msra.mxu1 %v913_v18  ;;  %v2895_v18 = vsub.s32 0, %v2887_v15 }
 0x112   : > { %1041 = vmatprep.subr.mxu1 %v1028_v19  ;;  %v2898_v19 = vand.u32 127, %v1031_v14  ;;  %v1127_v14 = vadd.s32 112, %v2887_v15 }
 0x113   : > { %v1034_v20 = vrot.slane %v2892_v17, %v2895_v18 }
 0x114   : > { %vm1131_vm15 = vcmp.eq.s32.totalorder %v2887_v15, %v2898_v19 }
 0x11a   : > { %v811_v12 = vpop.f32.mrf.mxu0 }
 0x11b   : > { %v812_v30 = vadd.f32 %v1909_v24, %v811_v12 }
 0x11c   : > { %v2153_v13 = vpop.f32.mrf.mxu0 }
 0x11d   : > { %v905_v34 = vadd.f32 %v904_v31, %v812_v30 }
 0x1c2   : > { %v709_v23 = vpop.f32.mrf.mxu1 }
 0x1c3   : > { %v710_v26 = vadd.f32 %v1907_v21, %v709_v23  ;;  %v1116_v21 = vadd.s32 24, %v2887_v15 }
 0x1c4   : > { %v2118_v28 = vpop.f32.mrf.mxu1 }
 0x1c5   : > { %v717_v29 = vadd.f32 %v716_v22, %v710_v26  ;;  %v1114_v22 = vadd.s32 8, %v2887_v15  ;;  %v1916_v26 = vsel %vm1131_vm15, 1.0, %v2405_v2  ;;  %vm1134_vm0 = vcmp.eq.s32.totalorder %v1116_v21, %v2898_v19 }
 0x1c7   : > { %v2773_v32 = vsub.f32 %v717_v29, %v715_v27  ;;  %v1118_v27 = vadd.s32 40, %v2887_v15  ;;  %vm1132_vm1 = vcmp.eq.s32.totalorder %v1114_v22, %v2898_v19  ;;  %v1117_v29 = vadd.s32 32, %v2887_v15 }
 0x1c9   : > { %721 = vst [vmem:[#allocation4] sm:$0x3] %v2773_v32  ;;  %vm719_vm13 = vcmp.gt.f32.partialorder %v2773_v32, 0.5  ;;  %vm1136_vm3 = vcmp.eq.s32.totalorder %v1118_v27, %v2898_v19  ;;  %vm1135_vm5 = vcmp.eq.s32.totalorder %v1117_v29, %v2898_v19 }
 0x1ca   : > { %v897_v35 = vpop.f32.mrf.mxu1 }
 0x1cb   : > { %v898_v36 = vadd.f32 %v1911_v33, %v897_v35  ;;  %v1919_v33 = vsel %vm1134_vm0, 1.0, %v2405_v2  ;;  %v1120_v35 = vadd.s32 56, %v2887_v15  ;;  %vm1145_vm0 = vcmp.eq.s32.totalorder %v1127_v14, %v2898_v19 }
 0x1cc   : > { %v2164_v38 = vpop.f32.mrf.mxu1 }
 0x1cd   : > { %v906_v39 = vadd.f32 %v905_v34, %v898_v36  ;;  %v1917_v34 = vsel %vm1132_vm1, 1.0, %v2405_v2  ;;  %v1119_v36 = vadd.s32 48, %v2887_v15  ;;  %vm1138_vm6 = vcmp.eq.s32.totalorder %v1120_v35, %v2898_v19 }
 0x1ce   : > { %vm1793_vm1 = vcmask 1041408  }
 0x1cf   : > { %v907_v40 = vsub.f32 %v906_v39, %v903_v37  ;;  %v1921_v39 = vsel %vm1136_vm3, 1.0, %v2405_v2  ;;  %vm1137_vm7 = vcmp.eq.s32.totalorder %v1119_v36, %v2898_v19 }
 0x1d1   : > { %vm908_vm12 = vcmp.gt.f32.partialorder %v907_v40, 1.0  ;;  %911 = vst.msk [vmem:[#allocation5] sm:$0x3] %vm910_vm11, %v907_v40  ;;  %v1920_v40 = vsel %vm1135_vm5, 1.0, %v2405_v2 }
 0x1d2   : > { %v909_v43 = vsel %vm908_vm12, 1.0, %v2405_v2 }
 0x1d3   : > { %2174 = vmatmul.mubr.msk.f32.vlgmr.msra.gmra.mxu1 %vm827_vm8, %v909_v43  ;;  %912 = vst.msk [vmem:[#allocation6] sm:$0x3] %vm910_vm11, %v909_v43  ;;  %v2791_v46 = vsel %vm910_vm11, %v909_v43, 0.0 }
 0x1d4   : > { %1042 = vmatpush1.msra.mxu1 %v1027_v42  ;;  %1105 = vmatprep.mubr.f32.mxu1 %v2405_v2 }
 0x1d5   : > { %1043 = vmatprep.subr.mxu1 %v1026_v44  ;;  %v1923_v44 = vsel %vm1138_vm6, 1.0, %v2405_v2 }
 0x1d6   : > { %1044 = vmatpush1.msra.mxu1 %v1025_v45  ;;  %v1922_v45 = vsel %vm1137_vm7, 1.0, %v2405_v2 }
 0x1d7   : > { %1045 = vmatprep.subr.mxu1 %v1024_v47  ;;  %v2935_v47 = vsub.s32 1, %v2887_v15 }
 0x1d8   : > { %1046 = vmatpush1.msra.mxu1 %v1023_v48 }
 0x1d9   : > { %1047 = vmatprep.subr.mxu1 %v1022_v49 }
 0x1da   : > { %1048 = vmatpush1.msra.mxu1 %v1021_v50 }
 0x1db   : > { %1049 = vmatprep.subr.mxu1 %v1020_v51 }
 0x1dc   : > { %1050 = vmatpush1.msra.mxu1 %v1019_v52 }
 0x1dd   : > { %1051 = vmatprep.subr.mxu1 %v1018_v53 }
 0x1de   : > { %1052 = vmatpush1.msra.mxu1 %v1017_v54 }
 0x1df   : > { %1053 = vmatprep.subr.mxu1 %v1016_v55  ;;  %v1122_v55 = vadd.s32 72, %v2887_v15 }
 0x1e0   : > { %1054 = vmatpush1.msra.mxu1 %v1015_v56  ;;  %v1121_v56 = vadd.s32 64, %v2887_v15 }
 0x1e1   : > { %1055 = vmatprep.subr.mxu1 %v1014_v57  ;;  %vm1140_vm8 = vcmp.eq.s32.totalorder %v1122_v55, %v2898_v19 }
 0x1e2   : > { %1056 = vmatpush1.msra.mxu1 %v1013_v58  ;;  %vm1139_vm9 = vcmp.eq.s32.totalorder %v1121_v56, %v2898_v19 }
 0x1e3   : > { %1057 = vmatprep.subr.mxu1 %v1012_v59  ;;  %v1124_v59 = vadd.s32 88, %v2887_v15 }
 0x1e4   : > { %1058 = vmatpush1.msra.mxu1 %v1011_v60  ;;  %v1123_v60 = vadd.s32 80, %v2887_v15 }
 0x1e5   : > { %1059 = vmatprep.subr.mxu1 %v1010_v61  ;;  %vm1142_vm10 = vcmp.eq.s32.totalorder %v1124_v59, %v2898_v19 }
 0x1e6   : > { %1060 = vmatpush1.msra.mxu1 %v1009_v62  ;;  %vm1141_vm11 = vcmp.eq.s32.totalorder %v1123_v60, %v2898_v19 }
 0x1e7   : > { %1061 = vmatprep.subr.mxu1 %v1008_v63  ;;  %v1925_v63 = vsel %vm1140_vm8, 1.0, %v2405_v2 }
 0x1e8   : > { %1062 = vmatpush1.msra.mxu1 %v1007_v0  ;;  %v1924_v0 = vsel %vm1139_vm9, 1.0, %v2405_v2 }
 0x1e9   : > { %1063 = vmatprep.subr.mxu1 %v1006_v1 }
 0x1ea   : > { %1064 = vmatpush1.msra.mxu1 %v1005_v3 }
 0x1eb   : > { %1065 = vmatprep.subr.mxu1 %v1004_v4  ;;  %v1927_v4 = vsel %vm1142_vm10, 1.0, %v2405_v2 }
 0x1ec   : > { %1066 = vmatpush1.msra.mxu1 %v1003_v5  ;;  %v1926_v5 = vsel %vm1141_vm11, 1.0, %v2405_v2 }
 0x1ed   : > { %1067 = vmatprep.subr.mxu1 %v1002_v6 }
 0x1ee   : > { %1068 = vmatpush1.msra.mxu1 %v1001_v7 }
 0x1ef   : > { %1069 = vmatprep.subr.mxu1 %v1000_v8  ;;  %v1126_v8 = vadd.s32 104, %v2887_v15 }
 0x1f0   : > { %1070 = vmatpush1.msra.mxu1 %v999_v9  ;;  %v1125_v9 = vadd.s32 96, %v2887_v15 }
 0x1f1   : > { %1071 = vmatprep.subr.mxu1 %v998_v10  ;;  %vm1144_vm12 = vcmp.eq.s32.totalorder %v1126_v8, %v2898_v19 }
 0x1f2   : > { %1072 = vmatpush1.msra.mxu1 %v997_v11  ;;  %v1929_v21 = vsel %vm1144_vm12, 1.0, %v2405_v2 }
 0x1f3   : > { %1915 = vmatmul.mubr.msk.f32.vlgmr.msra.gmra.mxu1 %vm719_vm13, %v2407_v41  ;;  %2211 = vmatprep.subr.mxu1 %v2405_v2  ;;  %v1115_v41 = vadd.s32 16, %v2887_v15 }
 0x1f4   : > { %2243 = vmatprep.mubr.msk.f32.mxu1 %vm2406_vm2, %v2405_v2 }
 0x1f5   : > { %vm1133_vm14 = vcmp.eq.s32.totalorder %v1115_v41, %v2898_v19 }
 0x1f6   : > { %v1918_v25 = vsel %vm1133_vm14, 1.0, %v2405_v2  ;;  %vm1143_vm14 = vcmp.eq.s32.totalorder %v1125_v9, %v2898_v19 }
 0x1f7   : > { %v1928_v22 = vsel %vm1143_vm14, 1.0, %v2405_v2 }
 0x293   : > { %v2885_v12 = vpop.f32.mrf.mxu1 }
 0x295   : > { %v2175_v13 = vpop.f32.mrf.mxu1 }
 0x296   : > { %v1128_v13 = vadd.s32 120, %v2887_v15 }
 0x298   : > { %vm1146_vm15 = vcmp.eq.s32.totalorder %v1128_v13, %v2898_v19 }
 0x299   : > { %v1931_v15 = vsel %vm1146_vm15, 1.0, %v2405_v2 }
 0x2b3   : > { %v1107_v23 = vpop.f32.mrf.mxu1 }
 0x2b4   : > { %v1108_v24 = vadd.f32 %v1107_v23, %v1034_v20 }
 0x2b6   : > { %v2911_v28 = vrot.slane %v1108_v24, %v2895_v18  ;;  %v2938_v48 = vrot.slane %v1108_v24, %v2935_v47 }
 0x2b8   : > { %v1185_v30 = vmul.f32 %v1918_v25, %v2911_v28  ;;  %v1183_v31 = vmul.f32 %v1916_v26, %v2911_v28  ;;  %v1186_v37 = vmul.f32 %v1919_v33, %v2911_v28  ;;  %v1184_v38 = vmul.f32 %v1917_v34, %v2911_v28 }
 0x2b9   : > { %v1188_v42 = vmul.f32 %v1921_v39, %v2911_v28  ;;  %v1187_v43 = vmul.f32 %v1920_v40, %v2911_v28  ;;  %v1190_v49 = vmul.f32 %v1923_v44, %v2911_v28  ;;  %v1189_v50 = vmul.f32 %v1922_v45, %v2911_v28 }
 0x2ba   : > { %1203 = vadd.xlane.f32.xlu1 %v1185_v30  ;;  %1199 = vadd.xlane.f32.xlu0 %v1183_v31  ;;  %v1435_v51 = vmul.f32 %v1917_v34, %v2938_v48  ;;  %v1434_v52 = vmul.f32 %v1916_v26, %v2938_v48  ;;  %v1437_v53 = vmul.f32 %v1919_v33, %v2938_v48  ;;  %v510_v33 = vsel %vm509_vm4, 1.0, %v2405_v2 }
 0x2bb   : > { %v1436_v54 = vmul.f32 %v1918_v25, %v2938_v48  ;;  %v1439_v57 = vmul.f32 %v1921_v39, %v2938_v48  ;;  %v1438_v58 = vmul.f32 %v1920_v40, %v2938_v48  ;;  %v1441_v61 = vmul.f32 %v1923_v44, %v2938_v48 }
 0x2bc   : > { %v1440_v62 = vmul.f32 %v1922_v45, %v2938_v48  ;;  %v1192_v1 = vmul.f32 %v1925_v63, %v2911_v28  ;;  %v1191_v3 = vmul.f32 %v1924_v0, %v2911_v28  ;;  %v1194_v6 = vmul.f32 %v1927_v4, %v2911_v28 }
 0x2bd   : > { %v1193_v7 = vmul.f32 %v1926_v5, %v2911_v28  ;;  %v1443_v10 = vmul.f32 %v1925_v63, %v2938_v48  ;;  %v1442_v11 = vmul.f32 %v1924_v0, %v2938_v48  ;;  %v1445_v41 = vmul.f32 %v1927_v4, %v2938_v48 }
 0x2be   : > { %1205 = vadd.xlane.f32.xlu1 %v1186_v37  ;;  %1201 = vadd.xlane.f32.xlu0 %v1184_v38  ;;  %v1444_v20 = vmul.f32 %v1926_v5, %v2938_v48  ;;  %v1196_v23 = vmul.f32 %v1929_v21, %v2911_v28  ;;  %v1195_v24 = vmul.f32 %v1928_v22, %v2911_v28  ;;  %v1930_v25 = vsel %vm1145_vm0, 1.0, %v2405_v2 }
 0x2bf   : > { %v1198_v26 = vmul.f32 %v1931_v15, %v2911_v28  ;;  %v1197_v27 = vmul.f32 %v1930_v25, %v2911_v28  ;;  %v1447_v29 = vmul.f32 %v1929_v21, %v2938_v48  ;;  %v1446_v19 = vmul.f32 %v1928_v22, %v2938_v48 }
 0x2c0   : > { %v1449_v30 = vmul.f32 %v1931_v15, %v2938_v48  ;;  %v1448_v31 = vmul.f32 %v1930_v25, %v2938_v48  ;;  %v720_v28 = vsel %vm719_vm13, 1.0, %v2405_v2  ;;  %v1794_v34 = vsel %vm1793_vm1, %v510_v33, 0.0 }
 0x2c1   : > { %v1806_v35 = vsel %vm1793_vm1, %v720_v28, 0.0  ;;  %vm1855_vm13 = vcmask 0  }
 0x2c2   : > { %1209 = vadd.xlane.f32.xlu1 %v1188_v42  ;;  %1207 = vadd.xlane.f32.xlu0 %v1187_v43 }
 0x2c6   : > { %1213 = vadd.xlane.f32.xlu1 %v1190_v49  ;;  %1211 = vadd.xlane.f32.xlu0 %v1189_v50 }
 0x2ca   : > { %1452 = vadd.xlane.f32.xlu1 %v1435_v51  ;;  %1450 = vadd.xlane.f32.xlu0 %v1434_v52 }
 0x2ce   : > { %1456 = vadd.xlane.f32.xlu1 %v1437_v53  ;;  %1454 = vadd.xlane.f32.xlu0 %v1436_v54 }
 0x2d2   : > { %1460 = vadd.xlane.f32.xlu1 %v1439_v57  ;;  %1458 = vadd.xlane.f32.xlu0 %v1438_v58 }
 0x2d6   : > { %1464 = vadd.xlane.f32.xlu1 %v1441_v61  ;;  %1462 = vadd.xlane.f32.xlu0 %v1440_v62 }
 0x2da   : > { %1217 = vadd.xlane.f32.xlu1 %v1192_v1  ;;  %1215 = vadd.xlane.f32.xlu0 %v1191_v3 }
 0x2de   : > { %1221 = vadd.xlane.f32.xlu1 %v1194_v6  ;;  %1219 = vadd.xlane.f32.xlu0 %v1193_v7 }
 0x2e2   : > { %1468 = vadd.xlane.f32.xlu1 %v1443_v10  ;;  %1466 = vadd.xlane.f32.xlu0 %v1442_v11 }
 0x2e6   : > { %1472 = vadd.xlane.f32.xlu1 %v1445_v41  ;;  %1470 = vadd.xlane.f32.xlu0 %v1444_v20 }
 0x2ea   : > { %1225 = vadd.xlane.f32.xlu1 %v1196_v23  ;;  %1223 = vadd.xlane.f32.xlu0 %v1195_v24 }
 0x2ee   : > { %1229 = vadd.xlane.f32.xlu1 %v1198_v26  ;;  %1227 = vadd.xlane.f32.xlu0 %v1197_v27 }
 0x2f2   : > { %1476 = vadd.xlane.f32.xlu1 %v1447_v29  ;;  %1474 = vadd.xlane.f32.xlu0 %v1446_v19 }
 0x2f6   : > { %1480 = vadd.xlane.f32.xlu1 %v1449_v30  ;;  %1478 = vadd.xlane.f32.xlu0 %v1448_v31 }
 0x2fa   : > { %1807 = vadd.xlane.f32.xlu1 %v1806_v35  ;;  %1795 = vadd.xlane.f32.xlu0 %v1794_v34 }
 0x2fe   : > { %1819 = vadd.xlane.f32.xlu0 %v2791_v46  ;;  %v1913_v46 = vld [vmem:[%s3386_s10] ss:$0 sm:$0xff] }
 0x2ff   : > { %v994_v55 = vadd.f32 %v1913_v46, %v2885_v12 }
 0x301   : > { %v1234_v58 = vrot.slane %v994_v55, %v2895_v18  ;;  %v3005_v5 = vrot.slane %v994_v55, %v2935_v47 }
 0x343   : > { %v1204_v36 = vpop.xlane.xlu1 %1203  ;;  %v1200_v37 = vpop.xlane.xlu0 %1199 }
 0x344   : > { %v1235_v59 = vmul.f32 %v1234_v58, %v1200_v37  ;;  %v1237_v7 = vmul.f32 %v1234_v58, %v1204_v36 }
 0x346   : > { %v3007_v6 = vmul.f32 0.088388346, %v1235_v59  ;;  %v3023_v15 = vmul.f32 0.088388346, %v1237_v7 }
 0x347   : > { %v1206_v38 = vpop.xlane.xlu1 %1205  ;;  %v1202_v16 = vpop.xlane.xlu0 %1201 }
 0x348   : > { %v1238_v1 = vmul.f32 %v1234_v58, %v1206_v38  ;;  %v1236_v3 = vmul.f32 %v1234_v58, %v1202_v16 }
 0x34a   : > { %v3015_v11 = vmul.f32 0.088388346, %v1238_v1  ;;  %v3017_v13 = vmul.f32 0.088388346, %v1236_v3 }
 0x34b   : > { %v1210_v39 = vpop.xlane.xlu1 %1209  ;;  %v1208_v40 = vpop.xlane.xlu0 %1207 }
 0x34c   : > { %v1240_v60 = vmul.f32 %v1234_v58, %v1210_v39  ;;  %v1239_v61 = vmul.f32 %v1234_v58, %v1208_v40 }
 0x34e   : > { %v3009_v12 = vmul.f32 0.088388346, %v1240_v60  ;;  %v3011_v8 = vmul.f32 0.088388346, %v1239_v61 }
 0x34f   : > { %v1214_v42 = vpop.xlane.xlu1 %1213  ;;  %v1212_v43 = vpop.xlane.xlu0 %1211 }
 0x350   : > { %v1242_v62 = vmul.f32 %v1234_v58, %v1214_v42  ;;  %v1241_v4 = vmul.f32 %v1234_v58, %v1212_v43  ;;  %v1268_v25 = vmax.f32 %v3017_v13, %v3009_v12  ;;  %v1267_v26 = vmax.f32 %v3007_v6, %v3011_v8 }
 0x352   : > { %v3013_v18 = vmul.f32 0.088388346, %v1242_v62  ;;  %v3019_v20 = vmul.f32 0.088388346, %v1241_v4 }
 0x353   : > { %v1453_v44 = vpop.xlane.xlu1 %1452  ;;  %v1451_v32 = vpop.xlane.xlu0 %1450 }
 0x354   : > { %v1487_v21 = vmul.f32 %v3005_v5, %v1453_v44  ;;  %v1486_v24 = vmul.f32 %v3005_v5, %v1451_v32  ;;  %v1270_v27 = vmax.f32 %v3015_v11, %v3013_v18  ;;  %v1269_v34 = vmax.f32 %v3023_v15, %v3019_v20 }
 0x356   : > { %v3037_v35 = vmul.f32 0.088388346, %v1487_v21  ;;  %v3043_v38 = vmul.f32 0.088388346, %v1486_v24 }
 0x357   : > { %v1457_v45 = vpop.xlane.xlu1 %1456  ;;  %v1455_v48 = vpop.xlane.xlu0 %1454 }
 0x358   : > { %v1489_v16 = vmul.f32 %v3005_v5, %v1457_v45  ;;  %v1488_v42 = vmul.f32 %v3005_v5, %v1455_v48 }
 0x35a   : > { %v3077_v21 = vmul.f32 0.088388346, %v1489_v16 }
 0x35b   : > { %v1461_v49 = vpop.xlane.xlu1 %1460  ;;  %v1459_v50 = vpop.xlane.xlu0 %1458 }
 0x35c   : > { %v1491_v43 = vmul.f32 %v3005_v5, %v1461_v49  ;;  %v1490_v44 = vmul.f32 %v3005_v5, %v1459_v50 }
 0x35e   : > { %v3066_v62 = vmul.f32 0.088388346, %v1491_v43  ;;  %v3071_v7 = vmul.f32 0.088388346, %v1490_v44 }
 0x35f   : > { %v1465_v51 = vpop.xlane.xlu1 %1464  ;;  %v1463_v52 = vpop.xlane.xlu0 %1462 }
 0x360   : > { %v1493_v32 = vmul.f32 %v3005_v5, %v1465_v51 }
 0x363   : > { %v1218_v53 = vpop.xlane.xlu1 %1217  ;;  %v1216_v54 = vpop.xlane.xlu0 %1215 }
 0x364   : > { %v1244_v14 = vmul.f32 %v1234_v58, %v1218_v53  ;;  %v1243_v41 = vmul.f32 %v1234_v58, %v1216_v54 }
 0x366   : > { %v3031_v30 = vmul.f32 0.088388346, %v1244_v14  ;;  %v3033_v31 = vmul.f32 0.088388346, %v1243_v41 }
 0x367   : > { %v1222_v56 = vpop.xlane.xlu1 %1221  ;;  %v1220_v57 = vpop.xlane.xlu0 %1219 }
 0x368   : > { %v1246_v22 = vmul.f32 %v1234_v58, %v1222_v56  ;;  %v1245_v23 = vmul.f32 %v1234_v58, %v1220_v57  ;;  %v1272_v54 = vmax.f32 %v1268_v25, %v3031_v30  ;;  %v1271_v55 = vmax.f32 %v1267_v26, %v3033_v31 }
 0x369   : > { %v1492_v57 = vmul.f32 %v3005_v5, %v1463_v52  ;;  %v1519_v26 = vmax.f32 %v3037_v35, %v3066_v62 }
 0x36a   : > { %v3039_v36 = vmul.f32 0.088388346, %v1246_v22  ;;  %v3041_v37 = vmul.f32 0.088388346, %v1245_v23  ;;  %v3083_v23 = vmul.f32 0.088388346, %v1488_v42 }
 0x36b   : > { %v1469_v63 = vpop.xlane.xlu1 %1468  ;;  %v1467_v0 = vpop.xlane.xlu0 %1466  ;;  %v3079_v22 = vmul.f32 0.088388346, %v1492_v57 }
 0x36c   : > { %v1274_v59 = vmax.f32 %v1270_v27, %v3039_v36  ;;  %v1273_v48 = vmax.f32 %v1269_v34, %v3041_v37  ;;  %v1494_v52 = vmul.f32 %v3005_v5, %v1467_v0  ;;  %v1518_v34 = vmax.f32 %v3043_v38, %v3071_v7 }
 0x36d   : > { %v1520_v44 = vmax.f32 %v3083_v23, %v3079_v22 }
 0x36f   : > { %v1473_v9 = vpop.xlane.xlu1 %1472  ;;  %v1471_v10 = vpop.xlane.xlu0 %1470 }
 0x370   : > { %v1497_v49 = vmul.f32 %v3005_v5, %v1473_v9  ;;  %v1496_v1 = vmul.f32 %v3005_v5, %v1471_v10  ;;  %v3073_v9 = vmul.f32 0.088388346, %v1493_v32 }
 0x372   : > { %v3085_v10 = vmul.f32 0.088388346, %v1497_v49  ;;  %v1521_v16 = vmax.f32 %v3077_v21, %v3073_v9 }
 0x373   : > { %v1226_v29 = vpop.xlane.xlu1 %1225  ;;  %v1224_v19 = vpop.xlane.xlu0 %1223 }
 0x374   : > { %v1248_v33 = vmul.f32 %v1234_v58, %v1226_v29  ;;  %v1247_v28 = vmul.f32 %v1234_v58, %v1224_v19  ;;  %v3091_v29 = vmul.f32 0.088388346, %v1494_v52  ;;  %v3093_v19 = vmul.f32 0.088388346, %v1496_v1 }
 0x376   : > { %v3046_v39 = vmul.f32 0.088388346, %v1248_v33  ;;  %v3048_v40 = vmul.f32 0.088388346, %v1247_v28  ;;  %v1522_v57 = vmax.f32 %v1518_v34, %v3091_v29 }
 0x377   : > { %v1230_v46 = vpop.xlane.xlu1 %1229  ;;  %v1228_v53 = vpop.xlane.xlu0 %1227 }
 0x378   : > { %v1250_v56 = vmul.f32 %v1234_v58, %v1230_v46  ;;  %v1249_v45 = vmul.f32 %v1234_v58, %v1228_v53  ;;  %v1276_v50 = vmax.f32 %v1272_v54, %v3046_v39  ;;  %v1275_v51 = vmax.f32 %v1271_v55, %v3048_v40 }
 0x379   : > { %v1495_v58 = vmul.f32 %v3005_v5, %v1469_v63  ;;  %v1525_v54 = vmax.f32 %v1521_v16, %v3085_v10 }
 0x37a   : > { %v3062_v60 = vmul.f32 0.088388346, %v1250_v56  ;;  %v3064_v61 = vmul.f32 0.088388346, %v1249_v45  ;;  %v1279_v24 = vmax.f32 %v1275_v51, %v1276_v50 }
 0x37b   : > { %v1477_v3 = vpop.xlane.xlu1 %1476  ;;  %v1475_v4 = vpop.xlane.xlu0 %1474  ;;  %v3089_v27 = vmul.f32 0.088388346, %v1495_v58 }
 0x37c   : > { %v1278_v14 = vmax.f32 %v1274_v59, %v3062_v60  ;;  %v1277_v41 = vmax.f32 %v1273_v48, %v3064_v61  ;;  %v1499_v63 = vmul.f32 %v3005_v5, %v1477_v3  ;;  %v1498_v0 = vmul.f32 %v3005_v5, %v1475_v4 }
 0x37d   : > { %v1523_v45 = vmax.f32 %v1519_v26, %v3089_v27  ;;  %v1524_v59 = vmax.f32 %v1520_v44, %v3093_v19 }
 0x37e   : > { %v1280_v25 = vmax.f32 %v1277_v41, %v1278_v14  ;;  %v3102_v32 = vmul.f32 0.088388346, %v1499_v63  ;;  %v3104_v46 = vmul.f32 0.088388346, %v1498_v0 }
 0x37f   : > { %v1481_v33 = vpop.xlane.xlu1 %1480  ;;  %v1479_v28 = vpop.xlane.xlu0 %1478 }
 0x380   : > { %v1281_v42 = vmax.f32 %v1279_v24, %v1280_v25  ;;  %v1501_v43 = vmul.f32 %v3005_v5, %v1481_v33  ;;  %v1500_v53 = vmul.f32 %v3005_v5, %v1479_v28  ;;  %v1527_v51 = vmax.f32 %v1523_v45, %v3102_v32 }
 0x381   : > { %v1526_v5 = vmax.f32 %v1522_v57, %v3104_v46 }
 0x382   : > { %v1282_v55 = vrot.slane %v1281_v42, 4  ;;  %v3108_v56 = vmul.f32 0.088388346, %v1501_v43  ;;  %v3113_v48 = vmul.f32 0.088388346, %v1500_v53 }
 0x383   : > { %v1530_v4 = vmax.f32 %v1526_v5, %v1527_v51 }
 0x384   : > { %v1283_v49 = vmax.f32 %v1281_v42, %v1282_v55  ;;  %v1529_v50 = vmax.f32 %v1525_v54, %v3108_v56  ;;  %v1528_v58 = vmax.f32 %v1524_v59, %v3113_v48 }
 0x386   : > { %v1284_v52 = vrot.slane %v1283_v49, 2  ;;  %v1531_v1 = vmax.f32 %v1528_v58, %v1529_v50 }
 0x388   : > { %v1285_v3 = vmax.f32 %v1283_v49, %v1284_v52  ;;  %v1532_v41 = vmax.f32 %v1530_v4, %v1531_v1 }
 0x38a   : > { %v1286_v14 = vrot.slane %v1285_v3, 1  ;;  %v1533_v26 = vrot.slane %v1532_v41, 4 }
 0x38c   : > { %v1287_v63 = vmax.f32 %v1285_v3, %v1286_v14  ;;  %v1534_v43 = vmax.f32 %v1532_v41, %v1533_v26 }
 0x38e   : > { %v1288_v0 = vsub.f32 %v3007_v6, %v1287_v63  ;;  %v1289_v24 = vsub.f32 %v3017_v13, %v1287_v63  ;;  %v1290_v25 = vsub.f32 %v3023_v15, %v1287_v63  ;;  %v1291_v33 = vsub.f32 %v3015_v11, %v1287_v63 }
 0x38f   : > { %v1292_v16 = vsub.f32 %v3011_v8, %v1287_v63  ;;  %v1293_v44 = vsub.f32 %v3009_v12, %v1287_v63  ;;  %v1294_v53 = vsub.f32 %v3019_v20, %v1287_v63  ;;  %v1295_v13 = vsub.f32 %v3013_v18, %v1287_v63 }
 0x390   : > { %v1304_v28 = vmul.f32 1.442695, %v1288_v0  ;;  %v1306_v34 = vmul.f32 1.442695, %v1289_v24  ;;  %v1308_v42 = vmul.f32 1.442695, %v1290_v25  ;;  %v1296_v15 = vsub.f32 %v3033_v31, %v1287_v63 }
 0x391   : > { %v1310_v6 = vmul.f32 1.442695, %v1291_v33  ;;  %v1312_v54 = vmul.f32 1.442695, %v1292_v16  ;;  %v1535_v11 = vrot.slane %v1534_v43, 2  ;;  %v1297_v55 = vsub.f32 %v3031_v30, %v1287_v63 }
 0x392   : > { %2300 = vpow2.f32 %v1304_v28  ;;  %v1314_v45 = vmul.f32 1.442695, %v1293_v44  ;;  %v1298_v8 = vsub.f32 %v3041_v37, %v1287_v63  ;;  %v1316_v57 = vmul.f32 1.442695, %v1294_v53 }
 0x393   : > { %2302 = vpow2.f32 %v1306_v34  ;;  %v1536_v12 = vmax.f32 %v1534_v43, %v1535_v11  ;;  %v1299_v59 = vsub.f32 %v3039_v36, %v1287_v63  ;;  %v1318_v20 = vmul.f32 1.442695, %v1295_v13 }
 0x394   : > { %2304 = vpow2.f32 %v1308_v42  ;;  %v1303_v49 = vsub.f32 %v3062_v60, %v1287_v63  ;;  %v1320_v18 = vmul.f32 1.442695, %v1296_v15  ;;  %v1301_v31 = vsub.f32 %v3046_v39, %v1287_v63 }
 0x395   : > { %2306 = vpow2.f32 %v1310_v6  ;;  %v1537_v50 = vrot.slane %v1536_v12, 1  ;;  %v1322_v51 = vmul.f32 1.442695, %v1297_v55  ;;  %v1302_v30 = vsub.f32 %v3064_v61, %v1287_v63 }
 0x396   : > { %2308 = vpow2.f32 %v1312_v54  ;;  %v1324_v5 = vmul.f32 1.442695, %v1298_v8  ;;  %v1326_v58 = vmul.f32 1.442695, %v1299_v59  ;;  %v1300_v36 = vsub.f32 %v3048_v40, %v1287_v63 }
 0x397   : > { %2310 = vpow2.f32 %v1314_v45  ;;  %v3134_v37 = vmax.f32 %v1536_v12, %v1537_v50  ;;  %v1334_v52 = vmul.f32 1.442695, %v1303_v49  ;;  %v1330_v60 = vmul.f32 1.442695, %v1301_v31 }
 0x398   : > { %2312 = vpow2.f32 %v1316_v57  ;;  %v1332_v61 = vmul.f32 1.442695, %v1302_v30 }
 0x399   : > { %2314 = vpow2.f32 %v1318_v20  ;;  %v1539_v1 = vsub.f32 %v3043_v38, %v3134_v37  ;;  %v1540_v39 = vsub.f32 %v3037_v35, %v3134_v37  ;;  %v1541_v4 = vsub.f32 %v3083_v23, %v3134_v37 }
 0x39a   : > { %2316 = vpow2.f32 %v1320_v18  ;;  %v1542_v38 = vsub.f32 %v3077_v21, %v3134_v37  ;;  %v1328_v35 = vmul.f32 1.442695, %v1300_v36  ;;  %v1543_v23 = vsub.f32 %v3071_v7, %v3134_v37 }
 0x39b   : > { %2318 = vpow2.f32 %v1322_v51  ;;  %v1555_v63 = vmul.f32 1.442695, %v1539_v1  ;;  %v1557_v0 = vmul.f32 1.442695, %v1540_v39  ;;  %v1559_v25 = vmul.f32 1.442695, %v1541_v4 }
 0x39c   : > { %2320 = vpow2.f32 %v1324_v5  ;;  %v1544_v21 = vsub.f32 %v3066_v62, %v3134_v37  ;;  %v1561_v28 = vmul.f32 1.442695, %v1542_v38  ;;  %v1545_v7 = vsub.f32 %v3079_v22, %v3134_v37 }
 0x39d   : > { %2322 = vpow2.f32 %v1326_v58  ;;  %v1563_v43 = vmul.f32 1.442695, %v1543_v23  ;;  %v1546_v6 = vsub.f32 %v3073_v9, %v3134_v37  ;;  %v1547_v54 = vsub.f32 %v3091_v29, %v3134_v37 }
 0x39e   : > { %2324 = vpow2.f32 %v1334_v52  ;;  %v1565_v13 = vmul.f32 1.442695, %v1544_v21  ;;  %v1554_v55 = vsub.f32 %v3108_v56, %v3134_v37  ;;  %v1567_v45 = vmul.f32 1.442695, %v1545_v7 }
 0x39f   : > { %v3141_v3 = vpop.eup %2300  ;;  %2326 = vpow2.f32 %v1330_v60  ;;  %v1548_v9 = vsub.f32 %v3089_v27, %v3134_v37  ;;  %v1553_v59 = vsub.f32 %v3113_v48, %v3134_v37  ;;  %v1569_v29 = vmul.f32 1.442695, %v1546_v6 }
 0x3a0   : > { %v3145_v14 = vpop.eup %2302  ;;  %2328 = vpow2.f32 %v1332_v61  ;;  %v1549_v49 = vsub.f32 %v3093_v19, %v3134_v37  ;;  %v1571_v18 = vmul.f32 1.442695, %v1547_v54  ;;  %v1552_v31 = vsub.f32 %v3102_v32, %v3134_v37 }
 0x3a1   : > { %v1336_v40 = vadd.f32 %v3145_v14, %v3141_v3  ;;  %v3151_v41 = vpop.eup %2304  ;;  %2330 = vpow2.f32 %v1555_v63  ;;  %v1585_v27 = vmul.f32 1.442695, %v1554_v55  ;;  %v1550_v48 = vsub.f32 %v3085_v10, %v3134_v37 }
 0x3a2   : > { %v3156_v26 = vpop.eup %2306  ;;  %2332 = vpow2.f32 %v1557_v0  ;;  %v1573_v30 = vmul.f32 1.442695, %v1548_v9  ;;  %v1551_v58 = vsub.f32 %v3104_v46, %v3134_v37  ;;  %v1583_v36 = vmul.f32 1.442695, %v1553_v59  ;;  %v1697_v59 = vld [vmem:[%s3389_s13 + $0x60] sm:$0xff] }
 0x3a3   : > { %v1337_v24 = vadd.f32 %v3151_v41, %v1336_v40  ;;  %v3161_v34 = vpop.eup %2308  ;;  %2334 = vpow2.f32 %v1328_v35  ;;  %v1575_v52 = vmul.f32 1.442695, %v1549_v49  ;;  %v1581_v1 = vmul.f32 1.442695, %v1552_v31  ;;  %v1691_v31 = vld [vmem:[%s3389_s13 + $0x30] sm:$0xff] }
 0x3a4   : > { %v3163_v16 = vpop.eup %2310  ;;  %2336 = vpow2.f32 %v1559_v25  ;;  %v1577_v46 = vmul.f32 1.442695, %v1550_v48  ;;  %v1579_v4 = vmul.f32 1.442695, %v1551_v58  ;;  %v1688_v48 = vld [vmem:[%s3389_s13 + $0x18] sm:$0xff] }
 0x3a5   : > { %v1338_v33 = vadd.f32 %v3156_v26, %v1337_v24  ;;  %v3168_v44 = vpop.eup %2312  ;;  %2338 = vpow2.f32 %v1561_v28 }
 0x3a6   : > { %v3170_v53 = vpop.eup %2314  ;;  %2340 = vpow2.f32 %v1563_v43 }
 0x3a7   : > { %v1339_v42 = vadd.f32 %v3161_v34, %v1338_v33  ;;  %v3175_v15 = vpop.eup %2316  ;;  %2342 = vpow2.f32 %v1565_v13 }
 0x3a8   : > { %v3179_v11 = vpop.eup %2318  ;;  %2344 = vpow2.f32 %v1567_v45 }
 0x3a9   : > { %v1340_v62 = vadd.f32 %v3163_v16, %v1339_v42  ;;  %v2321_v8 = vpop.eup %2320  ;;  %2346 = vpow2.f32 %v1569_v29  ;;  %v1696_v29 = vld [vmem:[%s3389_s13 + $0x58] sm:$0xff] }
 0x3aa   : > { %v2323_v57 = vpop.eup %2322  ;;  %2348 = vpow2.f32 %v1571_v18  ;;  %v1694_v18 = vld [vmem:[%s3389_s13 + $0x48] sm:$0xff] }
 0x3ab   : > { %v1341_v22 = vadd.f32 %v3168_v44, %v1340_v62  ;;  %v2325_v20 = vpop.eup %2324  ;;  %2350 = vpow2.f32 %v1585_v27  ;;  %v1690_v27 = vld [vmem:[%s3389_s13 + $0x28] sm:$0xff] }
 0x3ac   : > { %v2327_v56 = vpop.eup %2326  ;;  %2177 = vmatpush3.msra.mxu0 %v2325_v20  ;;  %2352 = vpow2.f32 %v1573_v30  ;;  %v1687_v30 = vld [vmem:[%s3389_s13 + $0x10] sm:$0xff] }
 0x3ad   : > { %v1342_v12 = vadd.f32 %v3170_v53, %v1341_v22  ;;  %v2329_v51 = vpop.eup %2328  ;;  %2178 = vmatprep.subr.mxu0 %v2405_v2  ;;  %2354 = vpow2.f32 %v1583_v36 }
 0x3ae   : > { %v3197_v5 = vpop.eup %2330  ;;  %2179 = vmatpush3.msra.mxu0 %v2329_v51  ;;  %2356 = vpow2.f32 %v1575_v52 }
 0x3af   : > { %v1343_v50 = vadd.f32 %v3175_v15, %v1342_v12  ;;  %v3202_v32 = vpop.eup %2332  ;;  %2180 = vmatprep.subr.mxu0 %v2405_v2  ;;  %2358 = vpow2.f32 %v1581_v1 }
 0x3b0   : > { %v2335_v10 = vpop.eup %2334  ;;  %v1587_v39 = vadd.f32 %v3202_v32, %v3197_v5  ;;  %2181 = vmatpush3.msra.mxu0 %v2327_v56  ;;  %2360 = vpow2.f32 %v1577_v46 }
 0x3b1   : > { %v1344_v19 = vadd.f32 %v3179_v11, %v1343_v50  ;;  %v3207_v61 = vpop.eup %2336  ;;  %2182 = vmatprep.subr.mxu0 %v2405_v2  ;;  %2362 = vpow2.f32 %v1579_v4  ;;  %v1692_v50 = vld [vmem:[%s3389_s13 + $0x38] sm:$0xff] }
 0x3b2   : > { %v1588_v40 = vadd.f32 %v3207_v61, %v1587_v39  ;;  %2183 = vmatpush3.msra.mxu0 %v2335_v10  ;;  %v3211_v38 = vpop.eup %2338 }
 0x3b3   : > { %v1345_v60 = vadd.f32 %v2321_v8, %v1344_v19  ;;  %2184 = vmatprep.subr.mxu0 %v2405_v2  ;;  %v3215_v0 = vpop.eup %2340  ;;  %v1685_v19 = vld [vmem:[%s3389_s13] sm:$0xff] }
 0x3b4   : > { %v1589_v63 = vadd.f32 %v3211_v38, %v1588_v40  ;;  %2185 = vmatpush3.msra.mxu0 %v2323_v57  ;;  %v3219_v25 = vpop.eup %2342 }
 0x3b5   : > { %v1346_v37 = vadd.f32 %v2323_v57, %v1345_v60  ;;  %2186 = vmatprep.subr.mxu0 %v2405_v2  ;;  %v3224_v28 = vpop.eup %2344  ;;  %v1109_v57 = vpop.f32.mrf.mxu1 }
 0x3b6   : > { %v1590_v23 = vadd.f32 %v3215_v0, %v1589_v63  ;;  %2187 = vmatpush3.msra.mxu0 %v2321_v8  ;;  %v2347_v43 = vpop.eup %2346 }
 0x3b7   : > { %v1347_v35 = vadd.f32 %v2335_v10, %v1346_v37  ;;  %2188 = vmatprep.subr.mxu0 %v2405_v2  ;;  %v2349_v62 = vpop.eup %2348 }
 0x3b8   : > { %v1591_v21 = vadd.f32 %v3219_v25, %v1590_v23  ;;  %2189 = vmatpush3.msra.mxu0 %v3179_v11  ;;  %v2351_v13 = vpop.eup %2350 }
 0x3b9   : > { %v1348_v24 = vadd.f32 %v2327_v56, %v1347_v35  ;;  %2190 = vmatprep.subr.mxu0 %v2405_v2  ;;  %v2353_v54 = vpop.eup %2352  ;;  %2212 = vmatpush3.msra.mxu1 %v2351_v13  ;;  %v1693_v56 = vld [vmem:[%s3389_s13 + $0x40] sm:$0xff] }
 0x3ba   : > { %v1592_v7 = vadd.f32 %v3224_v28, %v1591_v21  ;;  %2191 = vmatpush3.msra.mxu0 %v3175_v15  ;;  %v2355_v22 = vpop.eup %2354  ;;  %2213 = vmatprep.subr.mxu1 %v2405_v2  ;;  %v1778_v21 = vld [vmem:[#allocation7] sm:$0x3] }
 0x3bb   : > { %v1349_v33 = vadd.f32 %v2329_v51, %v1348_v24  ;;  %2192 = vmatprep.subr.mxu0 %v2405_v2  ;;  %v2357_v15 = vpop.eup %2356  ;;  %2214 = vmatpush3.msra.mxu1 %v2355_v22  ;;  %v1689_v51 = vld [vmem:[%s3389_s13 + $0x20] sm:$0xff] }
 0x3bc   : > { %v1593_v6 = vadd.f32 %v2347_v43, %v1592_v7  ;;  %2193 = vmatpush3.msra.mxu0 %v3170_v53  ;;  %v2359_v45 = vpop.eup %2358  ;;  %2215 = vmatprep.subr.mxu1 %v2405_v2 }
 0x3bd   : > { %v3227_v42 = vadd.f32 %v2325_v20, %v1349_v33  ;;  %2194 = vmatprep.subr.mxu0 %v2405_v2  ;;  %v2361_v53 = vpop.eup %2360  ;;  %2216 = vmatpush3.msra.mxu1 %v2359_v45  ;;  %v1695_v20 = vld [vmem:[%s3389_s13 + $0x50] sm:$0xff] }
 0x3be   : > { %v1594_v11 = vadd.f32 %v2349_v62, %v1593_v6  ;;  %2195 = vmatpush3.msra.mxu0 %v3168_v44  ;;  %v2363_v44 = vpop.eup %2362  ;;  %2217 = vmatprep.subr.mxu1 %v2405_v2 }
 0x3bf   : > { %2196 = vmatprep.subr.mxu0 %v2405_v2  ;;  %2218 = vmatpush3.msra.mxu1 %v2363_v44  ;;  %v1351_v58 = vrot.slane %v3227_v42, 4 }
 0x3c0   : > { %v1595_v55 = vadd.f32 %v2353_v54, %v1594_v11  ;;  %2197 = vmatpush3.msra.mxu0 %v3163_v16  ;;  %v1038_v16 = vrot.slane %v2892_v17, %v2935_v47  ;;  %2219 = vmatprep.subr.mxu1 %v2405_v2  ;;  %v1700_v47 = vld [vmem:[%s3389_s13 + $0x78] sm:$0xff]  ;;  %v1787_v11 = vld [vmem:[#allocation9] sm:$0x3] }
 0x3c1   : > { %2198 = vmatprep.subr.mxu0 %v2405_v2  ;;  %2220 = vmatpush3.msra.mxu1 %v2361_v53  ;;  %v1352_v36 = vadd.f32 %v1351_v58, %v3227_v42  ;;  %v1781_v42 = vmul.f32 0.8, %v1778_v21 }
 0x3c2   : > { %v1596_v8 = vadd.f32 %v2357_v15, %v1595_v55  ;;  %2199 = vmatpush3.msra.mxu0 %v3161_v34  ;;  %2221 = vmatprep.subr.mxu1 %v2405_v2 }
 0x3c3   : > { %2200 = vmatprep.subr.mxu0 %v2405_v2  ;;  %2222 = vmatpush3.msra.mxu1 %v2357_v15 }
 0x3c4   : > { %v1597_v9 = vadd.f32 %v2361_v53, %v1596_v8  ;;  %2201 = vmatpush3.msra.mxu0 %v3156_v26  ;;  %v1110_v26 = vadd.f32 %v1109_v57, %v1038_v16  ;;  %2223 = vmatprep.subr.mxu1 %v2405_v2  ;;  %v1796_v53 = vpop.xlane.xlu0 %1795 }
 0x3c5   : > { %2202 = vmatprep.subr.mxu0 %v2405_v2  ;;  %2224 = vmatpush3.msra.mxu1 %v2353_v54  ;;  %v1797_v8 = vsel %vm1793_vm1, %v1796_v53, 0.0 }
 0x3c6   : > { %v1598_v12 = vadd.f32 %v2363_v44, %v1597_v9  ;;  %2203 = vmatpush3.msra.mxu0 %v3151_v41  ;;  %2225 = vmatprep.subr.mxu1 %v2405_v2  ;;  %v1609_v49 = vrot.slane %v1110_v26, 1  ;;  %v1808_v44 = vpop.xlane.xlu1 %1807  ;;  %v1798_v9 = vrot.slane %v1797_v8, 4 }
 0x3c7   : > { %2204 = vmatprep.subr.mxu0 %v2405_v2  ;;  %2226 = vmatpush3.msra.mxu1 %v2349_v62  ;;  %v1809_v57 = vsel %vm1793_vm1, %v1808_v44, 0.0 }
 0x3c8   : > { %v1599_v34 = vadd.f32 %v2359_v45, %v1598_v12  ;;  %2205 = vmatpush3.msra.mxu0 %v3145_v14  ;;  %v1699_v14 = vld [vmem:[%s3389_s13 + $0x70] sm:$0xff]  ;;  %2227 = vmatprep.subr.mxu1 %v2405_v2  ;;  %v1820_v16 = vpop.xlane.xlu0 %1819  ;;  %v1799_v12 = vadd.f32 %v1798_v9, %v1797_v8 }
 0x3c9   : > { %2206 = vmatprep.subr.mxu0 %v2405_v2  ;;  %2228 = vmatpush3.msra.mxu1 %v2347_v43 }
 0x3ca   : > { %v1600_v17 = vadd.f32 %v2355_v22, %v1599_v34  ;;  %2207 = vmatpush3.msra.mxu0 %v3141_v3  ;;  %v1698_v3 = vld [vmem:[%s3389_s13 + $0x68] sm:$0xff]  ;;  %2229 = vmatprep.subr.mxu1 %v2405_v2  ;;  %v1810_v34 = vrot.slane %v1809_v57, 4 }
 0x3cb   : > { %2209 = vmatmul.mubr.f32.vlgmr.msra.gmra.mxu0 %v1110_v26  ;;  %2246 = vmatprep.subr.mxu0 %v2405_v2  ;;  %v1800_v26 = vrot.slane %v1799_v12, 2 }
 0x3cc   : > { %v3259_v41 = vadd.f32 %v2351_v13, %v1600_v17  ;;  %2247 = vmatpush3.msra.mxu0 %v1700_v47  ;;  %2230 = vmatpush3.msra.mxu1 %v3224_v28  ;;  %v1932_v28 = vld [vmem:[%s3390_s14] ss:$0 sm:$0xff]  ;;  %v1811_v47 = vadd.f32 %v1810_v34, %v1809_v57 }
 0x3cd   : > { %2248 = vmatprep.subr.mxu0 %v2405_v2  ;;  %2231 = vmatprep.subr.mxu1 %v2405_v2 }
 0x3ce   : > { %2249 = vmatpush3.msra.mxu0 %v1699_v14  ;;  %2232 = vmatpush3.msra.mxu1 %v3219_v25  ;;  %v1602_v60 = vrot.slane %v3259_v41, 4 }
 0x3cf   : > { %2250 = vmatprep.subr.mxu0 %v2405_v2  ;;  %2233 = vmatprep.subr.mxu1 %v2405_v2 }
 0x3d0   : > { %2251 = vmatpush3.msra.mxu0 %v1698_v3  ;;  %2234 = vmatpush3.msra.mxu1 %v3215_v0  ;;  %v1603_v39 = vadd.f32 %v1602_v60, %v3259_v41  ;;  %v1801_v41 = vadd.f32 %v1800_v26, %v1799_v12  ;;  %v1812_v3 = vrot.slane %v1811_v47, 2 }
 0x3d1   : > { %2252 = vmatprep.subr.mxu0 %v2405_v2  ;;  %2235 = vmatprep.subr.mxu1 %v2405_v2 }
 0x3d2   : > { %2253 = vmatpush3.msra.mxu0 %v1697_v59  ;;  %2236 = vmatpush3.msra.mxu1 %v3211_v38  ;;  %v1802_v59 = vrot.slane %v1801_v41, 1 }
 0x3d3   : > { %2254 = vmatprep.subr.mxu0 %v2405_v2  ;;  %2237 = vmatprep.subr.mxu1 %v2405_v2 }
 0x3d4   : > { %2255 = vmatpush3.msra.mxu0 %v1696_v29  ;;  %2238 = vmatpush3.msra.mxu1 %v3207_v61  ;;  %v1604_v61 = vrot.slane %v1603_v39, 2 }
 0x3d5   : > { %2256 = vmatprep.subr.mxu0 %v2405_v2  ;;  %2239 = vmatprep.subr.mxu1 %v2405_v2 }
 0x3d6   : > { %2257 = vmatpush3.msra.mxu0 %v1695_v20  ;;  %2278 = vmatprep.mubr.msk.f32.mxu0 %vm2406_vm2, %v2405_v2  ;;  %v1605_v46 = vadd.f32 %v1604_v61, %v1603_v39  ;;  %vm1779_vm2 = vcmp.gt.f32.partialorder %v1778_v21, 0.5  ;;  %v1813_v20 = vadd.f32 %v1812_v3, %v1811_v47 }
 0x3d7   : > { %2258 = vmatprep.subr.mxu0 %v2405_v2  ;;  %2240 = vmatpush3.msra.mxu1 %v3202_v32  ;;  %v1353_v32 = vrot.slane %v1352_v36, 2  ;;  %v1780_v6 = vsel %vm1779_vm2, 0.5, %v2405_v2 }
 0x3d8   : > { %2241 = vmatprep.subr.mxu1 %v2405_v2  ;;  %2259 = vmatpush3.msra.mxu0 %v1694_v18  ;;  %v1606_v37 = vrot.slane %v1605_v46, 1 }
 0x3d9   : > { %2242 = vmatpush3.msra.mxu1 %v3197_v5  ;;  %2260 = vmatprep.subr.mxu0 %v2405_v2  ;;  %v1686_v5 = vld [vmem:[%s3389_s13 + $0x8] sm:$0xff]  ;;  %v1354_v52 = vadd.f32 %v1353_v32, %v1352_v36 }
 0x3da   : > { %2244 = vmatmul.mubr.f32.vlgmr.msra.gmra.mxu1 %v1609_v49  ;;  %2261 = vmatpush3.msra.mxu0 %v1693_v56  ;;  %v1607_v35 = vadd.f32 %v1606_v37, %v1605_v46  ;;  %v1803_v49 = vadd.f32 %v1802_v59, %v1801_v41  ;;  %v1814_v56 = vrot.slane %v1813_v20, 1 }
 0x3db   : > { %2262 = vmatprep.subr.mxu0 %v2405_v2  ;;  %v1355_v10 = vrot.slane %v1354_v52, 1 }
 0x3dc   : > { %2263 = vmatpush3.msra.mxu0 %v1692_v50 }
 0x3dd   : > { %2264 = vmatprep.subr.mxu0 %v2405_v2  ;;  %v1356_v1 = vadd.f32 %v1355_v10, %v1354_v52 }
 0x3de   : > { %2265 = vmatpush3.msra.mxu0 %v1691_v31 }
 0x3df   : > { %2266 = vmatprep.subr.mxu0 %v2405_v2  ;;  %2364 = vrcp.f32 %v1356_v1 }
 0x3e0   : > { %2267 = vmatpush3.msra.mxu0 %v1690_v27  ;;  %2366 = vrcp.f32 %v1607_v35  ;;  %v1804_v27 = vmul.f32 0.00390625, %v1803_v49 }
 0x3e1   : > { %2268 = vmatprep.subr.mxu0 %v2405_v2 }
 0x3e2   : > { %2269 = vmatpush3.msra.mxu0 %v1689_v51 }
 0x3e3   : > { %2270 = vmatprep.subr.mxu0 %v2405_v2 }
 0x3e4   : > { %2271 = vmatpush3.msra.mxu0 %v1688_v48 }
 0x3e5   : > { %2272 = vmatprep.subr.mxu0 %v2405_v2 }
 0x3e6   : > { %2273 = vmatpush3.msra.mxu0 %v1687_v30  ;;  %v1792_v30 = vld [vmem:[#allocation10] sm:$0x1] }
 0x3e7   : > { %2274 = vmatprep.subr.mxu0 %v2405_v2  ;;  %v1805_v58 = vadd.f32 %v1804_v27, %v1792_v30 }
 0x3e8   : > { %2275 = vmatpush3.msra.mxu0 %v1686_v5  ;;  %v1815_v5 = vadd.f32 %v1814_v56, %v1813_v20 }
 0x3e9   : > { %2276 = vmatprep.subr.mxu0 %v2405_v2 }
 0x3ea   : > { %2277 = vmatpush3.msra.mxu0 %v1685_v19  ;;  %v1816_v52 = vmul.f32 0.00390625, %v1815_v5 }
 0x3ec   : > { %v2365_v4 = vpop.eup %2364  ;;  %v1817_v60 = vadd.f32 %v1816_v52, %v1805_v58 }
 0x3ed   : > { %v2367_v0 = vpop.eup %2366 }
 0x48b   : > { %v1423_v40 = vpop.f32.mrf.mxu0 }
 0x48c   : > { %v1428_v38 = vmul.f32 %v2365_v4, %v1423_v40  ;;  %v1843_v4 = vld [vmem:[#allocation11] sm:$0x1] }
 0x48d   : > { %v2210_v63 = vpop.f32.mrf.mxu0 }
 0x48e   : > { %1429 = vst [vmem:[#allocation8] sm:$0x1] %v1428_v38  ;;  %v1847_v38 = vstv %s1846_s29 }
 0x48f   : > { %vm1848_vm3 = vcmp.eq.s32.totalorder %v1847_v38, 1 }
 0x49a   : > { %v1677_v24 = vpop.f32.mrf.mxu1 }
 0x49b   : > { %v1682_v23 = vmul.f32 %v2367_v0, %v1677_v24  ;;  %v1850_v24 = vld [vmem:[#allocation12] sm:$0x1] }
 0x49c   : > { %v2245_v25 = vpop.f32.mrf.mxu1 }
 0x49d   : > { %1683 = vst [vmem:[#allocation8 + $0x1] sm:$0x1] %v1682_v23 }
 0x4a4   : > { %v1684_v33 = vld [vmem:[#allocation8] sm:$0x3] }
 0x4a5   : > { %2279 = vmatmul.mubr.f32.vlgmr.msra.gmra.mxu0 %v1684_v33 }
 0x565   : > { %v1774_v7 = vpop.f32.mrf.mxu0 }
 0x566   : > { %v1775_v43 = vadd.f32 %v1932_v28, %v1774_v7 }
 0x567   : > { %v2280_v62 = vpop.f32.mrf.mxu0 }
 0x568   : > { %v1782_v13 = vadd.f32 %v1781_v42, %v1775_v43 }
 0x56a   : > { %v1783_v54 = vsub.f32 %v1782_v13, %v1780_v6 }
 0x56c   : > { %vm1784_vm4 = vcmp.gt.f32.partialorder %v1783_v54, 0.5  ;;  %1786 = vst [vmem:[#allocation7] sm:$0x3] %v1783_v54 }
 0x56d   : > { %v1785_v22 = vsel %vm1784_vm4, 1.0, %v2405_v2  ;;  %v1821_v2 = vsel %vm1793_vm1, %v1820_v16, 0.0 }
 0x56e   : > { %v1830_v15 = vsel %vm1793_vm1, %v1785_v22, 0.0  ;;  %v1788_v55 = vadd.f32 %v1787_v11, %v1785_v22  ;;  %v1822_v17 = vrot.slane %v1821_v2, 4 }
 0x56f   : > { %1831 = vadd.xlane.f32.xlu1 %v1830_v15 }
 0x570   : > { %1789 = vst [vmem:[#allocation9] sm:$0x3] %v1788_v55  ;;  %v1823_v14 = vadd.f32 %v1822_v17, %v1821_v2 }
 0x572   : > { %v1824_v29 = vrot.slane %v1823_v14, 2 }
 0x574   : > { %v1825_v18 = vadd.f32 %v1824_v29, %v1823_v14 }
 0x576   : > { %v1826_v51 = vrot.slane %v1825_v18, 1 }
 0x577   : > { %v1790_v45 = vld [vmem:[#allocation9] sm:$0x3] }
 0x578   : > { %1791 = vst [vmem:[%s3391_s15] sm:$0x3] %v1790_v45  ;;  %v1827_v36 = vadd.f32 %v1826_v51, %v1825_v18 }
 0x57a   : > { %v1828_v1 = vmul.f32 0.015625, %v1827_v36 }
 0x57c   : > { %v1829_v46 = vadd.f32 %v1828_v1, %v1817_v60 }
 0x5f8   : > { %v1832_v50 = vpop.xlane.xlu1 %1831 }
 0x5f9   : > { %v1833_v31 = vsel %vm1793_vm1, %v1832_v50, 0.0 }
 0x5fa   : > { %v1834_v48 = vrot.slane %v1833_v31, 4 }
 0x5fc   : > { %v1835_v19 = vadd.f32 %v1834_v48, %v1833_v31 }
 0x5fe   : > { %v1836_v32 = vrot.slane %v1835_v19, 2 }
 0x600   : > { %v1837_v10 = vadd.f32 %v1836_v32, %v1835_v19 }
 0x602   : > { %v1838_v39 = vrot.slane %v1837_v10, 1 }
 0x604   : > { %v1839_v61 = vadd.f32 %v1838_v39, %v1837_v10 }
 0x606   : > { %v1840_v37 = vmul.f32 0.045454547, %v1839_v61 }
 0x608   : > { %v1841_v40 = vadd.f32 %v1840_v37, %v1829_v46 }
 0x60a   : > { %v1844_v35 = vsub.f32 %v1841_v40, %v1843_v4  ;;  %1856 = vst.msk [vmem:[#allocation10] sm:$0x1] %vm1855_vm13, %v1841_v40  ;;  %1857 = vst.msk [vmem:[#allocation11] sm:$0x1] %vm1855_vm13, %v1841_v40  ;;  %v1851_v63 = vmul.f32 0.001, %v1841_v40 }
 0x60c   : > { %v1845_v0 = vand.u32 2147483647, %v1844_v35  ;;  %v1852_v25 = vadd.f32 %v1851_v63, %v1850_v24 }
 0x60e   : > { %v1849_v23 = vsel %vm1848_vm3, %v1845_v0, 0.0 }
 0x60f   : > { %v1853_v33 = vmul.f32 0.001, %v1849_v23 }
 0x611   : > { %v1854_v21 = vadd.f32 %v1853_v33, %v1852_v25 }
 0x613   : > { %1858 = vst.msk [vmem:[#allocation12] sm:$0x1] %vm1855_vm13, %v1854_v21  ;;  %v1859_v28 = vmul.f32 0.33333334, %v1854_v21 }
 0x615   : > { %1860 = vst.msk [vmem:[#allocation13] sm:$0x1] %vm1855_vm13, %v1859_v28 }
 0x616   : > { %2381 = shalt.err (!%p2378_p12)
}
 0x617   : > { %2282 = dma.vmem_to_hbm [thread:$0]  (%p2285_p5), %s1872_s0, 16, %s3392_s16, [#allocation14]  }
 0x618   : > { %2397 = dma.done.wait (%p2285_p5), [#allocation14], 16  }
 0x619   : > { %2399 = vsyncadd (%p2285_p5), [#allocation14], 4294967280 }
 0x61a PF: > { %s28_s21 = sadd.s32 1, %s2402_s21  }
 0x61b   : > { %p25_p13 = scmp.ge.s32.totalorder %s28_s21, 5  }
 0x61d   :  { %27 = sbr.rel (!%p25_p13) target bundleno = 3 (0x3), region = 116 }
 0x622   :  { %1887 = vsyncpa [#allocation14], 1 }
 0x623   :  { %1889 = vsyncpa [#allocation14 + $0x1], 1 }

</bundles_post_ra>
